<compile_context>
chip_gen: v6e
topology: v6e:2x2x1
jax: 0.10.0
libtpu: 0.0.40
codegen_flags: <defaults>
</compile_context>

<pallas_src>
import functools

import jax
import jax.numpy as jnp
from jax.experimental import pallas as pl
from jax.experimental.pallas import tpu as pltpu


ACT_DTYPE = jnp.bfloat16
LANE = 128


# ----------------------------------------------------------------------------
# Helpers
# ----------------------------------------------------------------------------
def _round_up(x, m):
    return ((x + m - 1) // m) * m


def _cpad(c):
    return _round_up(c, LANE)


@functools.lru_cache(maxsize=None)
def _is_v5e():
    try:
        kind = jax.devices()[0].device_kind.lower()
    except Exception:
        return False
    return ("v5 lite" in kind) or ("v5e" in kind)


def _pick_tn(Np, M=1 << 30):
    # 512/256-wide N tiles feed the 256-deep MXU on v6e/v7x; 128 on v5e.
    if not _is_v5e():
        if Np % 512 == 0 and M >= 2048:
            return 512
        if Np % 256 == 0:
            return 256
    return 128


def _pick_tk(Kp):
    cap = 128 if _is_v5e() else 512
    for cand in (512, 256, 128):
        if cand <= cap and Kp % cand == 0:
            return cand
    return 128


def _pick_tm(M):
    """Pick (tm, padded M) minimising M padding instead of rounding M up to 512."""
    cap = 256 if _is_v5e() else 512
    Mp8 = _round_up(M, 8)
    if Mp8 <= cap:
        return Mp8, Mp8
    cands = (256, 128) if _is_v5e() else (512, 384, 256, 128)
    best_tm, best_mp = None, None
    for c in cands:
        mp = _round_up(M, c)
        if best_mp is None or mp < best_mp:
            best_tm, best_mp = c, mp
    return best_tm, best_mp


def _conv_vmem_limit(in_bytes, w_bytes, out_bytes, work_bytes):
    # Double-buffered blocks + in-kernel temporaries, with margin.
    est = 2 * (in_bytes + w_bytes + out_bytes) + work_bytes
    return int(min(max(est * 2, 16 << 20), 48 << 20))


# ----------------------------------------------------------------------------
# Matmul kernels (1x1 convs, stem im2col)
# ----------------------------------------------------------------------------
def _matmul_fused_kernel(x_ref, w_ref, s_ref, b_ref, o_ref, acc_ref, *, act):
    """Tiled bf16 matmul, folded-BN scale/bias and optional LeakyReLU(0.1)."""
    @pl.when(pl.program_id(2) == 0)
    def _():
        acc_ref[...] = jnp.zeros_like(acc_ref)

    acc_ref[...] += jnp.dot(x_ref[...], w_ref[...],
                            preferred_element_type=jnp.float32)

    @pl.when(pl.program_id(2) == pl.num_programs(2) - 1)
    def _():
        y = acc_ref[...] * s_ref[...] + b_ref[...]
        if act:
            y = jnp.where(y > 0, y, 0.1 * y)
        o_ref[...] = y.astype(o_ref.dtype)


def matmul_scale_bias_act(x2d, w, scale, bias, act=True):
    """y = act((x2d @ w) * scale + bias); returns padded-N output (no crop)."""
    M, K = x2d.shape
    Kp, Np = w.shape
    tm, Mp = _pick_tm(M)
    tn = _pick_tn(Np, M)
    tk = _pick_tk(Kp)

    xp = x2d
    if Mp > M or Kp > K:
        xp = jnp.pad(x2d, ((0, Mp - M), (0, Kp - K)))

    grid = (Mp // tm, Np // tn, Kp // tk)
    out = pl.pallas_call(
        functools.partial(_matmul_fused_kernel, act=act),
        out_shape=jax.ShapeDtypeStruct((Mp, Np), x2d.dtype),
        grid_spec=pltpu.PrefetchScalarGridSpec(
            num_scalar_prefetch=0,
            grid=grid,
            in_specs=[
                pl.BlockSpec((tm, tk), lambda i, j, k: (i, k)),
                pl.BlockSpec((tk, tn), lambda i, j, k: (k, j)),
                pl.BlockSpec((1, tn), lambda i, j, k: (0, j)),
                pl.BlockSpec((1, tn), lambda i, j, k: (0, j)),
            ],
            out_specs=pl.BlockSpec((tm, tn), lambda i, j, k: (i, j)),
            scratch_shapes=[pltpu.VMEM((tm, tn), jnp.float32)],
        ),
        compiler_params=pltpu.CompilerParams(
            dimension_semantics=("parallel", "parallel", "arbitrary")),
    )(xp, w, scale, bias)
    return out if Mp == M else out[:M]


def _matmul2_fused_kernel(xa_ref, xb_ref, wa_ref, wb_ref, s_ref, b_ref, o_ref, *, act):
    """Dual-source 1x1 CBL: consumes two channel slabs without materializing a concat."""
    y = jnp.dot(xa_ref[...], wa_ref[...], preferred_element_type=jnp.float32)
    y = y + jnp.dot(xb_ref[...], wb_ref[...], preferred_element_type=jnp.float32)
    y = y * s_ref[...] + b_ref[...]
    if act:
        y = jnp.where(y > 0, y, 0.1 * y)
    o_ref[...] = y.astype(o_ref.dtype)


def matmul2_scale_bias_act(xa2d, xb2d, wa, wb, scale, bias, act=True):
    M, Ka = xa2d.shape
    Kb = xb2d.shape[1]
    Np = wa.shape[1]
    tm, Mp = _pick_tm(M)
    tn = _pick_tn(Np, M)
    if Mp > M:
        xa2d = jnp.pad(xa2d, ((0, Mp - M), (0, 0)))
        xb2d = jnp.pad(xb2d, ((0, Mp - M), (0, 0)))
    grid = (Mp // tm, Np // tn)
    out = pl.pallas_call(
        functools.partial(_matmul2_fused_kernel, act=act),
        out_shape=jax.ShapeDtypeStruct((Mp, Np), xa2d.dtype),
        grid_spec=pltpu.PrefetchScalarGridSpec(
            num_scalar_prefetch=0,
            grid=grid,
            in_specs=[
                pl.BlockSpec((tm, Ka), lambda i, j: (i, 0)),
                pl.BlockSpec((tm, Kb), lambda i, j: (i, 0)),
                pl.BlockSpec((Ka, tn), lambda i, j: (0, j)),
                pl.BlockSpec((Kb, tn), lambda i, j: (0, j)),
                pl.BlockSpec((1, tn), lambda i, j: (0, j)),
                pl.BlockSpec((1, tn), lambda i, j: (0, j)),
            ],
            out_specs=pl.BlockSpec((tm, tn), lambda i, j: (i, j)),
        ),
        compiler_params=pltpu.CompilerParams(
            dimension_semantics=("parallel", "parallel")),
    )(xa2d, xb2d, wa, wb, scale, bias)
    return out if Mp == M else out[:M]


# ----------------------------------------------------------------------------
# Direct 3x3 convolution kernels (stride 1 and stride 2)
# ----------------------------------------------------------------------------
def _conv3x3_s1_kernel(x_ref, w_ref, s_ref, b_ref, o_ref, *, act):
    """Direct 3x3 stride-1 conv: per kh, one K=3*Cin matmul of a W-shifted bf16 slab
    into a flat f32 accumulator; the valid W window is cropped once at the end."""
    _, Hp, Wp, C = x_ref.shape
    _, Ho, Wo, Ct = o_ref.shape
    Wv = Wp - 2                                   # multiple of 8 by construction
    x = x_ref[0]                                  # (Hp, Wp, C) bf16
    acc = jnp.zeros((Ho * Wv, Ct), jnp.float32)
    for kh in range(3):
        rows = x[kh:kh + Ho]                      # (Ho, Wp, C)
        # slab col w = [x[w+0] | x[w+1] | x[w+2]] channels  (kw = 0,1,2)
        slab = jnp.concatenate(
            [rows[:, 0:Wv], rows[:, 1:1 + Wv], rows[:, 2:2 + Wv]], axis=-1)
        wk = w_ref[kh * 3 * C:(kh + 1) * 3 * C, :]
        acc = acc + jnp.dot(slab.reshape(Ho * Wv, 3 * C), wk,
                            preferred_element_type=jnp.float32)
    y = acc.reshape(Ho, Wv, Ct)[:, :Wo, :] * s_ref[...] + b_ref[...]
    if act:
        y = jnp.where(y > 0, y, 0.1 * y)
    o_ref[0] = y.astype(o_ref.dtype)


def conv3x3_s1(p, x, act=True):
    B, H, W, C = x.shape
    Wv = _round_up(W, 8)
    Wp = Wv + 2
    xpad = jnp.pad(x, ((0, 0), (1, 1), (1, Wp - W - 1), (0, 0)))
    w, s, b = p["w"], p["scale"], p["bias"]
    Np = w.shape[1]
    tn = _pick_tn(Np, B * H * W)
    vlim = _conv_vmem_limit((H + 2) * Wp * C * 2, 9 * C * tn * 2, H * W * tn * 2,
                            H * Wv * tn * 8 + H * Wv * 3 * C * 4)
    grid = (B, Np // tn)
    out = pl.pallas_call(
        functools.partial(_conv3x3_s1_kernel, act=act),
        out_shape=jax.ShapeDtypeStruct((B, H, W, Np), x.dtype),
        grid_spec=pltpu.PrefetchScalarGridSpec(
            num_scalar_prefetch=0,
            grid=grid,
            in_specs=[
                pl.BlockSpec((1, H + 2, Wp, C), lambda bi, n: (bi, 0, 0, 0)),
                pl.BlockSpec((9 * C, tn), lambda bi, n: (0, n)),
                pl.BlockSpec((1, tn), lambda bi, n: (0, n)),
                pl.BlockSpec((1, tn), lambda bi, n: (0, n)),
            ],
            out_specs=pl.BlockSpec((1, H, W, tn), lambda bi, n: (bi, 0, 0, n)),
        ),
        compiler_params=pltpu.CompilerParams(
            dimension_semantics=("parallel", "parallel"),
            vmem_limit_bytes=vlim),
    )(xpad, w, s, b)
    return out


def _conv3x3_s2_kernel(x_ref, w_ref, s_ref, b_ref, o_ref, *, act):
    """Direct 3x3 stride-2 conv on a channel-pair-packed input.
    Packed col w holds input cols (2w | kw=0, 2w+1 | kw=1); the kw=2 tap (col 2w+2)
    is the even half of packed col w+1 -> one K=3*Cin matmul per kh."""
    _, Hpad, Wp2, C2 = x_ref.shape
    _, Ho, Wo, Ct = o_ref.shape
    C = C2 // 2
    Wv = Wp2 - 1                                  # multiple of 8 by construction
    x = x_ref[0].reshape(Hpad // 2, 2, Wp2, C2)   # even/odd padded rows
    acc = jnp.zeros((Ho * Wv, Ct), jnp.float32)
    for kh in range(3):
        if kh == 0:
            rows = x[0:Ho, 0]                     # padded rows 0,2,...
        elif kh == 1:
            rows = x[0:Ho, 1]                     # padded rows 1,3,...
        else:
            rows = x[1:Ho + 1, 0]                 # padded rows 2,4,...
        slab = jnp.concatenate([rows[:, 0:Wv], rows[:, 1:1 + Wv, :C]], axis=-1)
        wk = w_ref[kh * 3 * C:(kh + 1) * 3 * C, :]
        acc = acc + jnp.dot(slab.reshape(Ho * Wv, 3 * C), wk,
                            preferred_element_type=jnp.float32)
    y = acc.reshape(Ho, Wv, Ct)[:, :Wo, :] * s_ref[...] + b_ref[...]
    if act:
        y = jnp.where(y > 0, y, 0.1 * y)
    o_ref[0] = y.astype(o_ref.dtype)


def conv3x3_s2(p, x, act=True):
    B, H, W, C = x.shape
    Ho, Wo = (H + 1) // 2, (W + 1) // 2
    Hp = 2 * Ho + 2                               # even, covers padded rows 0..2*Ho
    Wv2 = _round_up(Wo, 8)
    Wp = 2 * Wv2 + 2                              # packed width Wp//2 = Wv2 + 1
    xpad = jnp.pad(x, ((0, 0), (1, Hp - H - 1), (1, Wp - W - 1), (0, 0)))
    xr = xpad.reshape(B, Hp, Wp // 2, 2 * C)      # free (contiguous) reshape
    w, s, b = p["w"], p["scale"], p["bias"]
    Np = w.shape[1]
    tn = _pick_tn(Np, B * Ho * Wo)
    vlim = _conv_vmem_limit(Hp * Wp * C * 2, 9 * C * tn * 2, Ho * Wo * tn * 2,
                            Ho * Wv2 * tn * 8 + Ho * Wv2 * 3 * C * 4)
    grid = (B, Np // tn)
    out = pl.pallas_call(
        functools.partial(_conv3x3_s2_kernel, act=act),
        out_shape=jax.ShapeDtypeStruct((B, Ho, Wo, Np), x.dtype),
        grid_spec=pltpu.PrefetchScalarGridSpec(
            num_scalar_prefetch=0,
            grid=grid,
            in_specs=[
                pl.BlockSpec((1, Hp, Wp // 2, 2 * C), lambda bi, n: (bi, 0, 0, 0)),
                pl.BlockSpec((9 * C, tn), lambda bi, n: (0, n)),
                pl.BlockSpec((1, tn), lambda bi, n: (0, n)),
                pl.BlockSpec((1, tn), lambda bi, n: (0, n)),
            ],
            out_specs=pl.BlockSpec((1, Ho, Wo, tn), lambda bi, n: (bi, 0, 0, n)),
        ),
        compiler_params=pltpu.CompilerParams(
            dimension_semantics=("parallel", "parallel"),
            vmem_limit_bytes=vlim),
    )(xr, w, s, b)
    return out


# ----------------------------------------------------------------------------
# Fused SPP: pool5 / pool9=pool5(pool5) / pool13=pool5(pool9) + channel concat
# ----------------------------------------------------------------------------
def _spp_kernel(x_ref, o_ref, pad_ref):
    _, H, W, C = x_ref.shape
    neg = jnp.finfo(x_ref.dtype).min
    x = x_ref[0]

    def pool5(src):
        pad_ref[...] = jnp.full(pad_ref.shape, neg, pad_ref.dtype)
        pad_ref[2:2 + H, 2:2 + W, :] = src
        v = pad_ref[...]
        m = v[0:H]
        for dh in range(1, 5):
            m = jnp.maximum(m, v[dh:dh + H])
        r = m[:, 0:W]
        for dw in range(1, 5):
            r = jnp.maximum(r, m[:, dw:dw + W])
        return r

    p5 = pool5(x)
    p9 = pool5(p5)
    p13 = pool5(p9)
    o_ref[0, :, :, 0 * C:1 * C] = p13
    o_ref[0, :, :, 1 * C:2 * C] = p9
    o_ref[0, :, :, 2 * C:3 * C] = p5
    o_ref[0, :, :, 3 * C:4 * C] = x


def spp_pool(x):
    """SpatialPyramidPooling([5,9,13]): returns cat([pool13, pool9, pool5, x], C)."""
    B, H, W, C = x.shape
    return pl.pallas_call(
        _spp_kernel,
        out_shape=jax.ShapeDtypeStruct((B, H, W, 4 * C), x.dtype),
        grid_spec=pltpu.PrefetchScalarGridSpec(
            num_scalar_prefetch=0,
            grid=(B,),
            in_specs=[pl.BlockSpec((1, H, W, C), lambda b: (b, 0, 0, 0))],
            out_specs=pl.BlockSpec((1, H, W, 4 * C), lambda b: (b, 0, 0, 0)),
            scratch_shapes=[pltpu.VMEM((H + 4, W + 4, C), x.dtype)],
        ),
        compiler_params=pltpu.CompilerParams(dimension_semantics=("parallel",)),
    )(x)


# ----------------------------------------------------------------------------
# Glue: stem im2col (cin=3 only), layer application
# ----------------------------------------------------------------------------
def im2col_s2(x):
    """3x3/stride-2 im2col; only used by the stem (raw image, cin=3)."""
    B, H, W, C = x.shape
    xp = jnp.pad(x, ((0, 0), (1, 1), (1, 1), (0, 0)))
    Ho, Wo = (H + 1) // 2, (W + 1) // 2
    cols = []
    for kh in range(3):
        for kw in range(3):
            cols.append(xp[:, kh:kh + 2 * Ho:2, kw:kw + 2 * Wo:2, :])
    patches = jnp.concatenate(cols, axis=-1)
    return patches.reshape(B * Ho * Wo, 9 * C), (B, Ho, Wo)


def cbl_apply(p, x, act=True):
    """Conv2d(no bias) + folded BN + LeakyReLU(0.1) (or conv+bias if act=False).
    Activations are carried at 128-padded channel counts (no per-layer crops)."""
    mode = p["mode"]
    if mode == "conv3s1":
        return conv3x3_s1(p, x, act=act)
    if mode == "conv3s2":
        return conv3x3_s2(p, x, act=act)
    if mode == "im2col_s2":
        x2d, (B, Ho, Wo) = im2col_s2(x)
        y = matmul_scale_bias_act(x2d, p["w"], p["scale"], p["bias"], act=act)
        return y.reshape(B, Ho, Wo, -1)
    B, H, W, C = x.shape                          # 1x1 conv
    y = matmul_scale_bias_act(x.reshape(B * H * W, C),
                              p["w"], p["scale"], p["bias"], act=act)
    return y.reshape(B, H, W, -1)


def cbl_dual_apply(p, xa, xb, act=True):
    """1x1 CBL over the implicit channel-concat [xa, xb] (no concat materialized)."""
    B, H, W, Ca = xa.shape
    Cb = xb.shape[-1]
    y = matmul2_scale_bias_act(xa.reshape(B * H * W, Ca), xb.reshape(B * H * W, Cb),
                               p["wa"], p["wb"], p["scale"], p["bias"], act=act)
    return y.reshape(B, H, W, -1)


def apply_seq(params, x):
    for p in params:
        x = cbl_apply(p, x)
    return x


def apply_five_dual(params, xa, xb):
    x = cbl_dual_apply(params[0], xa, xb)
    for p in params[1:]:
        x = cbl_apply(p, x)
    return x


def upsample2x_nearest(x):
    B, H, W, C = x.shape
    y = jnp.broadcast_to(x[:, :, None, :, None, :], (B, H, 2, W, 2, C))
    return y.reshape(B, 2 * H, 2 * W, C)


def upsample_apply(p, x):
    # TODO(synk): fuse the nearest-2x duplication into the 1x1 CBL's output stores.
    return upsample2x_nearest(cbl_apply(p, x))


def apply_yolo_head(params, x):
    x = cbl_apply(params[0], x)                   # 3x3 cbl
    x = cbl_apply(params[1], x, act=False)        # 1x1 conv with bias, no BN/act
    return x[..., :params[1]["cout"]]             # crop padded channels at the head


# ----------------------------------------------------------------------------
# Parameter initialization (deterministic, synthetic). Weights/scale/bias are padded
# once here, against the producer's *padded* channel count (padded-channel carry).
# ----------------------------------------------------------------------------
class KeyGen:
    def __init__(self, seed):
        self.key = jax.random.PRNGKey(seed)

    def __call__(self):
        self.key, sub = jax.random.split(self.key)
        return sub


def _fold_bn(cout, Np):
    # BN folded with PyTorch defaults: gamma=1, beta=0, mean=0, var=1
    scale = jnp.zeros((1, Np), jnp.float32).at[0, :cout].set(1.0 / (1.0 + 1e-5) ** 0.5)
    bias = jnp.zeros((1, Np), jnp.float32)
    return scale, bias


def init_cbl(kg, cin, cout, k, stride=1, cin_carried=None):
    cin_c = _cpad(cin) if cin_carried is None else cin_carried
    Np = _cpad(cout)
    fan_in = k * k * cin
    w = jax.random.normal(kg(), (k, k, cin, cout), jnp.float32) * (2.0 / fan_in) ** 0.5
    if k == 1:
        mode = "mm1x1"
        wp = jnp.zeros((cin_c, Np), jnp.float32).at[:cin, :cout].set(w[0, 0])
    elif stride == 1:
        mode = "conv3s1"
        wp = (jnp.zeros((3, 3, cin_c, Np), jnp.float32)
              .at[:, :, :cin, :cout].set(w)).reshape(9 * cin_c, Np)
    elif cin_c % LANE == 0:
        mode = "conv3s2"
        wp = (jnp.zeros((3, 3, cin_c, Np), jnp.float32)
              .at[:, :, :cin, :cout].set(w)).reshape(9 * cin_c, Np)
    else:
        mode = "im2col_s2"                        # stem only (raw image channels)
        wp = (jnp.zeros((3, 3, cin_c, Np), jnp.float32)
              .at[:, :, :cin, :cout].set(w)).reshape(9 * cin_c, Np)
        wp = jnp.pad(wp, ((0, _cpad(9 * cin_c) - 9 * cin_c), (0, 0)))
    scale, bias = _fold_bn(cout, Np)
    return {"w": wp.astype(ACT_DTYPE), "scale": scale, "bias": bias,
            "mode": mode, "cin": cin, "cout": cout}


def init_cbl_dual(kg, cin_a, cin_b, cout):
    """First 1x1 CBL of a five-conv group, consuming two channel slabs."""
    ca_p, cb_p = _cpad(cin_a), _cpad(cin_b)
    Np = _cpad(cout)
    fan_in = cin_a + cin_b
    w = jax.random.normal(kg(), (fan_in, cout), jnp.float32) * (2.0 / fan_in) ** 0.5
    wa = jnp.zeros((ca_p, Np), jnp.float32).at[:cin_a, :cout].set(w[:cin_a])
    wb = jnp.zeros((cb_p, Np), jnp.float32).at[:cin_b, :cout].set(w[cin_a:])
    scale, bias = _fold_bn(cout, Np)
    return {"wa": wa.astype(ACT_DTYPE), "wb": wb.astype(ACT_DTYPE),
            "scale": scale, "bias": bias, "mode": "dual1x1",
            "cin": fan_in, "cout": cout}


def init_conv_bias(kg, cin, cout):
    cin_c = _cpad(cin)
    Np = _cpad(cout)
    w = jax.random.normal(kg(), (cin, cout), jnp.float32) * (1.0 / cin) ** 0.5
    b = jax.random.normal(kg(), (cout,), jnp.float32) * 0.01
    wp = jnp.zeros((cin_c, Np), jnp.float32).at[:cin, :cout].set(w)
    scale = jnp.zeros((1, Np), jnp.float32).at[0, :cout].set(1.0)
    bias = jnp.zeros((1, Np), jnp.float32).at[0, :cout].set(b)
    return {"w": wp.astype(ACT_DTYPE), "scale": scale, "bias": bias,
            "mode": "mm1x1", "cin": cin, "cout": cout}


def init_three_conv(kg, fl, cin):
    return [init_cbl(kg, cin, fl[0], 1),
            init_cbl(kg, fl[0], fl[1], 3),
            init_cbl(kg, fl[1], fl[0], 1)]


def init_five_conv_dual(kg, fl, cin_a, cin_b):
    return [init_cbl_dual(kg, cin_a, cin_b, fl[0]),
            init_cbl(kg, fl[0], fl[1], 3),
            init_cbl(kg, fl[1], fl[0], 1),
            init_cbl(kg, fl[0], fl[1], 3),
            init_cbl(kg, fl[1], fl[0], 1)]


def init_yolo_head(kg, fl, cin):
    return [init_cbl(kg, cin, fl[0], 3), init_conv_bias(kg, fl[0], fl[1])]


def init_backbone(kg, out_filters):
    # TODO(synk): stride-matched CBL stand-in for the EfficientNet-b0 MBConv backbone.
    return [init_cbl(kg, 3, 32, 3, stride=2, cin_carried=3),            # stem
            init_cbl(kg, 32, 24, 3, stride=2),                          # -> stride 4
            init_cbl(kg, 24, out_filters[0], 3, stride=2),              # -> stride 8  (x2)
            init_cbl(kg, out_filters[0], out_filters[1], 3, stride=2),  # -> stride 16 (x1)
            init_cbl(kg, out_filters[1], out_filters[2], 3, stride=2)]  # -> stride 32 (x0)


def backbone_apply(params, x):
    x = cbl_apply(params[0], x)
    x = cbl_apply(params[1], x)
    x2 = cbl_apply(params[2], x)
    x1 = cbl_apply(params[3], x2)
    x0 = cbl_apply(params[4], x1)
    return x2, x1, x0


def init_yolo_body(seed, anchors_mask, num_classes, phi=0):
    kg = KeyGen(seed)
    out_filters = {0: [40, 112, 320], 1: [40, 112, 320], 2: [48, 120, 352],
                   3: [48, 136, 384], 4: [56, 160, 448], 5: [64, 176, 512],
                   6: [72, 200, 576], 7: [80, 224, 640]}[phi]
    P = {}
    P["backbone"] = init_backbone(kg, out_filters)
    P["conv1"] = init_three_conv(kg, [512, 1024], out_filters[2])
    P["conv2"] = init_three_conv(kg, [512, 1024], 2048)
    P["upsample1"] = init_cbl(kg, 512, 256, 1)
    P["conv_for_P4"] = init_cbl(kg, out_filters[1], 256, 1)
    P["five1"] = init_five_conv_dual(kg, [256, 512], 256, 256)
    P["upsample2"] = init_cbl(kg, 256, 128, 1)
    P["conv_for_P3"] = init_cbl(kg, out_filters[0], 128, 1)
    P["five2"] = init_five_conv_dual(kg, [128, 256], 128, 128)
    f2 = len(anchors_mask[0]) * (5 + num_classes)
    P["head3"] = init_yolo_head(kg, [256, f2], 128)
    P["down1"] = init_cbl(kg, 128, 256, 3, stride=2)
    P["five3"] = init_five_conv_dual(kg, [256, 512], 256, 256)
    f1 = len(anchors_mask[1]) * (5 + num_classes)
    P["head2"] = init_yolo_head(kg, [512, f1], 256)
    P["down2"] = init_cbl(kg, 256, 512, 3, stride=2)
    P["five4"] = init_five_conv_dual(kg, [512, 1024], 512, 512)
    f0 = len(anchors_mask[2]) * (5 + num_classes)
    P["head1"] = init_yolo_head(kg, [1024, f0], 512)
    return P


# ----------------------------------------------------------------------------
# YoloBody forward
# ----------------------------------------------------------------------------
def yolo_body_forward(P, x_nchw):
    x = jnp.transpose(x_nchw, (0, 2, 3, 1)).astype(ACT_DTYPE)   # NCHW -> NHWC bf16

    x2, x1, x0 = backbone_apply(P["backbone"], x)

    P5 = apply_seq(P["conv1"], x0)
    P5 = spp_pool(P5)                                # fused [pool13|pool9|pool5|x]
    P5 = apply_seq(P["conv2"], P5)

    P5_up = upsample_apply(P["upsample1"], P5)
    P4c = cbl_apply(P["conv_for_P4"], x1)
    P4 = apply_five_dual(P["five1"], P4c, P5_up)     # implicit cat([P4, P5_up])

    P4_up = upsample_apply(P["upsample2"], P4)
    P3c = cbl_apply(P["conv_for_P3"], x2)
    P3 = apply_five_dual(P["five2"], P3c, P4_up)     # implicit cat([P3, P4_up])

    P3_down = cbl_apply(P["down1"], P3)
    P4 = apply_five_dual(P["five3"], P3_down, P4)    # implicit cat([P3_down, P4])

    P4_down = cbl_apply(P["down2"], P4)
    P5 = apply_five_dual(P["five4"], P4_down, P5)    # implicit cat([P4_down, P5])

    out2 = apply_yolo_head(P["head3"], P3)
    out1 = apply_yolo_head(P["head2"], P4)
    out0 = apply_yolo_head(P["head1"], P5)

    to_nchw = lambda t: jnp.transpose(t.astype(jnp.float32), (0, 3, 1, 2))
    return to_nchw(out0), to_nchw(out1), to_nchw(out2)


# ----------------------------------------------------------------------------
if __name__ == "__main__":
    anchors_mask = [[0, 1, 2], [3, 4, 5], [6, 7, 8]]
    num_classes = 4
    fo = len(anchors_mask[0]) * (5 + num_classes)   # 27

    params = init_yolo_body(0, anchors_mask, num_classes, phi=0)

    x = jax.random.normal(jax.random.PRNGKey(0), (2, 3, 64, 64), jnp.float32)
    out0, out1, out2 = yolo_body_forward(params, x)
    (out0, out1, out2) = jax.block_until_ready((out0, out1, out2))

    assert out0.shape == (2, fo, 2, 2), out0.shape     # stride 32 head
    assert out1.shape == (2, fo, 4, 4), out1.shape     # stride 16 head
    assert out2.shape == (2, fo, 8, 8), out2.shape     # stride 8  head
    assert all(bool(jnp.isfinite(o).all()) for o in (out0, out1, out2))
    print("KERNEL_OK")
</pallas_src>

<mosaic_0001>
module attributes {stable_mosaic.version = 11 : i64} {
  func.func @_matmul_fused_kernel(%arg0: i32, %arg1: i32, %arg2: i32, %arg3: memref<512x128xbf16, #tpu.memory_space<vmem>>, %arg4: memref<128x128xbf16, #tpu.memory_space<vmem>>, %arg5: memref<1x128xf32, #tpu.memory_space<vmem>>, %arg6: memref<1x128xf32, #tpu.memory_space<vmem>>, %arg7: memref<512x128xbf16, #tpu.memory_space<vmem>>, %arg8: memref<512x128xf32, #tpu.memory_space<vmem>>) attributes {dimension_semantics = [#tpu.dimension_semantics<parallel>, #tpu.dimension_semantics<parallel>, #tpu.dimension_semantics<arbitrary>], iteration_bounds = array<i64: 4, 1, 1>, scalar_prefetch = 0 : i64, scratch_operands = 1 : i64, tpu.core_type = #tpu.core_type<tc>, window_params = [{transform_indices = @transform_0, window_bounds = array<i64: 512, 128>}, {transform_indices = @transform_1, window_bounds = array<i64: 128, 128>}, {transform_indices = @transform_2, window_bounds = array<i64: 1, 128>}, {transform_indices = @transform_3, window_bounds = array<i64: 1, 128>}, {transform_indices = @transform_4, window_bounds = array<i64: 512, 128>}]} {
    %c0_i32 = arith.constant 0 : i32
    %0 = arith.cmpi eq, %arg2, %c0_i32 : i32
    %1 = arith.extui %0 : i1 to i32
    %c0_i32_0 = arith.constant 0 : i32
    %2 = arith.cmpi ne, %1, %c0_i32_0 : i32
    scf.if %2 {
      %cst_10 = arith.constant 0.000000e+00 : f32
      %12 = vector.broadcast %cst_10 : f32 to vector<512x128xf32>
      %c0_11 = arith.constant 0 : index
      %c0_12 = arith.constant 0 : index
      %13 = vector.load %arg8[%c0_11, %c0_12] : memref<512x128xf32, #tpu.memory_space<vmem>>, vector<512x128xf32>
      tpu.vector_store %arg8[%c0_11, %c0_12], %12 {strides = array<i32>} : memref<512x128xf32, #tpu.memory_space<vmem>>, vector<512x128xf32>,
    } else {
    }
    %c0 = arith.constant 0 : index
    %c0_1 = arith.constant 0 : index
    %3 = vector.load %arg8[%c0, %c0_1] : memref<512x128xf32, #tpu.memory_space<vmem>>, vector<512x128xf32>
    %c0_2 = arith.constant 0 : index
    %c0_3 = arith.constant 0 : index
    %4 = vector.load %arg3[%c0_2, %c0_3] : memref<512x128xbf16, #tpu.memory_space<vmem>>, vector<512x128xbf16>
    %c0_4 = arith.constant 0 : index
    %c0_5 = arith.constant 0 : index
    %5 = vector.load %arg4[%c0_4, %c0_5] : memref<128x128xbf16, #tpu.memory_space<vmem>>, vector<128x128xbf16>
    %cst = arith.constant dense<0.000000e+00> : vector<512x128xf32>
    %6 = tpu.matmul %4, %5, %cst {dimension_numbers = #tpu.dot_dimension_numbers<[1], [0], [0], [1], [0, 0, 1, 1], [], []>} : vector<512x128xbf16>, vector<128x128xbf16>, vector<512x128xf32> -> vector<512x128xf32>
    %7 = arith.addf %3, %6 : vector<512x128xf32>
    %c0_6 = arith.constant 0 : index
    %c0_7 = arith.constant 0 : index
    %8 = vector.load %arg8[%c0_6, %c0_7] : memref<512x128xf32, #tpu.memory_space<vmem>>, vector<512x128xf32>
    tpu.vector_store %arg8[%c0_6, %c0_7], %7 {strides = array<i32>} : memref<512x128xf32, #tpu.memory_space<vmem>>, vector<512x128xf32>,
    %c0_i32_8 = arith.constant 0 : i32
    %9 = arith.cmpi eq, %arg2, %c0_i32_8 : i32
    %10 = arith.extui %9 : i1 to i32
    %c0_i32_9 = arith.constant 0 : i32
    %11 = arith.cmpi ne, %10, %c0_i32_9 : i32
    scf.if %11 {
      %c0_10 = arith.constant 0 : index
      %c0_11 = arith.constant 0 : index
      %12 = vector.load %arg8[%c0_10, %c0_11] : memref<512x128xf32, #tpu.memory_space<vmem>>, vector<512x128xf32>
      %c0_12 = arith.constant 0 : index
      %c0_13 = arith.constant 0 : index
      %13 = vector.load %arg5[%c0_12, %c0_13] : memref<1x128xf32, #tpu.memory_space<vmem>>, vector<1x128xf32>
      %14 = vector.broadcast %13 : vector<1x128xf32> to vector<512x128xf32>
      %15 = arith.mulf %12, %14 : vector<512x128xf32>
      %c0_14 = arith.constant 0 : index
      %c0_15 = arith.constant 0 : index
      %16 = vector.load %arg6[%c0_14, %c0_15] : memref<1x128xf32, #tpu.memory_space<vmem>>, vector<1x128xf32>
      %17 = vector.broadcast %16 : vector<1x128xf32> to vector<512x128xf32>
      %18 = arith.addf %15, %17 : vector<512x128xf32>
      %cst_16 = arith.constant 0.000000e+00 : f32
      %19 = vector.broadcast %cst_16 : f32 to vector<512x128xf32>
      %20 = arith.cmpf ogt, %18, %19 : vector<512x128xf32>
      %cst_17 = arith.constant 1.000000e-01 : f32
      %21 = vector.broadcast %cst_17 : f32 to vector<512x128xf32>
      %22 = arith.mulf %21, %18 : vector<512x128xf32>
      %23 = arith.select %20, %18, %22 : vector<512x128xi1>, vector<512x128xf32>
      %24 = arith.truncf %23 : vector<512x128xf32> to vector<512x128xbf16>
      %c0_18 = arith.constant 0 : index
      %c0_19 = arith.constant 0 : index
      %25 = vector.load %arg7[%c0_18, %c0_19] : memref<512x128xbf16, #tpu.memory_space<vmem>>, vector<512x128xbf16>
      tpu.vector_store %arg7[%c0_18, %c0_19], %24 {strides = array<i32>} : memref<512x128xbf16, #tpu.memory_space<vmem>>, vector<512x128xbf16>,
    } else {
    }
    return
  }
  func.func @transform_0(%arg0: i32, %arg1: i32, %arg2: i32) -> (i32, i32) {
    %c0_i32 = arith.constant 0 : i32
    return %arg0, %arg2 : i32, i32
  }
  func.func @transform_1(%arg0: i32, %arg1: i32, %arg2: i32) -> (i32, i32) {
    %c0_i32 = arith.constant 0 : i32
    return %arg2, %arg1 : i32, i32
  }
  func.func @transform_2(%arg0: i32, %arg1: i32, %arg2: i32) -> (i32, i32) {
    %c0_i32 = arith.constant 0 : i32
    %c0_i32_0 = arith.constant 0 : i32
    return %c0_i32, %arg1 : i32, i32
  }
  func.func @transform_3(%arg0: i32, %arg1: i32, %arg2: i32) -> (i32, i32) {
    %c0_i32 = arith.constant 0 : i32
    %c0_i32_0 = arith.constant 0 : i32
    return %c0_i32, %arg1 : i32, i32
  }
  func.func @transform_4(%arg0: i32, %arg1: i32, %arg2: i32) -> (i32, i32) {
    %c0_i32 = arith.constant 0 : i32
    return %arg0, %arg1 : i32, i32
  }
}

</mosaic_0001>

<bundles_post_ra>
// kernel: tpu_custom_call.1
= control target key start
LH: loop header
LB: loop body
LE: loop exit
PB: predicated region body
PF: predicated region fallthrough
CT: control target
= control target key end

     0   :  { %s3277_s0 = inlined_call_operand.hbm [shape: bf16[2048,128], index: 0, kind: input, shape index: {}]   ;;  %s3278_s1 = inlined_call_operand.hbm [shape: bf16[128,128], index: 1, kind: input, shape index: {}]   ;;  %s3279_s2 = inlined_call_operand.vmem [shape: f32[1,128], index: 2, kind: input, shape index: {}]   ;;  %s3280_s3 = inlined_call_operand.vmem [shape: f32[1,128], index: 3, kind: input, shape index: {}]   ;;  %s3281_s4 = inlined_call_operand.hbm [shape: bf16[2048,128], index: 4, kind: output, shape index: {}]  }
   0x1   :  { %3285 = sst [smem:[#allocation12_spill]] %s3278_s1 }
   0x2   :  { %9 = vsyncpa [#allocation4], 0 }
   0x3   :  { %11 = vsyncpa [#allocation4 + $0x1], 0 }
   0x4   :  { %12 = vsyncpa [#allocation7], 0 }
   0x5   :  { %13 = vsyncpa [#allocation5], 0 }
   0x6   :  { %15 = vsyncpa [#allocation5 + $0x1], 0  ;;  %s2836_s15 = smov 0   ;;  %s2838_s16 = smov 0  }
   0x7   :  { %s2840_s17 = smov 0   ;;  %s2842_s18 = smov 0  }
   0x8   :  { %s2844_s19 = smov 0   ;;  %s2846_s20 = smov 0  }
   0x9 LB: > { %s2029_s21 = sadd.s32 4294967295, %s2802_s20   ;;  %s2030_s22 = sadd.s32 4294967294, %s2802_s20   ;;  %s2802_s20 = sphi %s2846_s20, %s21_s20   ;;  %s2798_s19 = sphi %s2844_s19, %s3304_s19   ;;  %s2794_s18 = sphi %s2842_s18, %s3303_s18   ;;  %s2790_s17 = sphi %s2840_s17, %s3302_s17   ;;  %s2786_s16 = sphi %s2838_s16, %s3301_s16   ;;  %s2782_s15 = sphi %s2836_s15, %s3300_s15  }
   0xa   : > { %p62_p0 = scmp.ne.s32.totalorder %s2786_s16, %s2782_s15  ;;  %p2870_p1 = scmp.eq.s32.totalorder %s2029_s21, 0 }
   0xb   : > { %p2874_p2 = scmp.eq.s32.totalorder %s2029_s21, 3  ;;  %p174_p3 = scmp.eq.s32.totalorder %s2030_s22, 3 }
   0xc   : > { %p2880_p4 = por %p2870_p1, %p62_p0  ;;  %p2031_p5 = scmp.ge.s32.totalorder %s2802_s20, 1 }
   0xd   : > { %p2885_p6 = por %p174_p3, %p62_p0  ;;  %p181_p7 = scmp.lt.s32.totalorder %s2802_s20, 5 }
   0xe   : > { %s2804_s28 = smov [#allocation6]   ;;  %s40_s5 = sadd.s32 1, %s2798_s19 }
   0xf   : > { %s3289_s26 = scalar_select %p2885_p6, 1, 0 }
  0x10   : > { %p2890_p8 = pnand %p2031_p5, %p181_p7  ;;  %s197_s29 = sshll.u32 %s2804_s28, 4  ;;  %s198_s29 = int_to_ptr.vmem [resolvable:$true] %s197_s29 }
  0x11   : > { %s2675_s6 = scalar_lea.vmem %s198_s29, 1024  ;;  %p2683_p3 = scmp.lt.s32.totalorder %s198_s29, %s198_s29 }
  0x12   : > { %p2555_p9 = pneg %p2890_p8  ;;  %p2676_p12 = scmp.ne.s32.totalorder %s198_s29, %s2675_s6 }
  0x13   : > { %p2684_p5 = scmp.lt.s32.totalorder %s2675_s6, %s2675_s6 }
  0x14   : > { %p2898_p10 = pnand %p2555_p9, %p2870_p1 }
  0x15   : > { %p2685_p7 = por %p2684_p5, %p2683_p3 }
  0x16   : > { %p2666_p11 = pneg %p2898_p10 }
  0x18   : > { %p2678_p13 = pnand %p2676_p12, %p2666_p11 }
  0x1a   : > { %p2679_p0 = pneg %p2678_p13 }
  0x1c   : > { %p2686_p6 = pnand %p2685_p7, %p2679_p0 }
  0x1e   : > { %2689 = shalt.err (!%p2686_p6)
}
  0x1f   : > { %s3282_s7 = smov 64   ;;  %s3283_s8 = smov 4  }
  0x20   : > { %s3292_s1 = sld [smem:[#allocation12_spill]]  ;;  %p42_p6 = scmp.ge.s32.totalorder %s40_s5, 4 }
  0x21   : > { %s49_s11 = sadd.s32 1, %s2790_s17  ;;  %p56_p9 = scmp.ne.s32.totalorder %s2790_s17, %s2786_s16 }
  0x22   : > { %p57_p11 = scmp.eq.s32.totalorder %s2802_s20, 0  ;;  %s3306_s5 = smov (%p42_p6, %s40_s5), 0 }
  0x23   : > { %p2925_p13 = por %p2874_p2, %p56_p9  ;;  %s44_s14 = ssub.s32 %s2798_s19, %s3306_s5 }
  0x24   : > { %p2919_p12 = por %p57_p11, %p56_p9  ;;  %p2568_p0 = scmp.lt.s32.totalorder %s2802_s20, 4 }
  0x25   : > { %s3294_s13 = scalar_select %p2925_p13, 1, 0 }
  0x26   : > { %2558 = dma.hbm_to_vmem [thread:$0]  (!%p2898_p10), %s3292_s1, 1024, %s198_s29, [#allocation7], %s3282_s7, %s3282_s7, %s3283_s8  }
  0x27   : > { %p47_p10 = scmp.eq.s32.totalorder %s44_s14, 0  ;;  %s223_s21 = sand.u32 1, %s2790_s17  }
  0x28   : > { %s2036_s22 = sshll.u32 %s223_s21, 8  ;;  %s2154_s29 = sshll.u32 %s2798_s19, 12 }
  0x29   : > { %s2934_s28 = scalar_select %p47_p10, %s2790_s17, %s49_s11  }
  0x2a   : > { %s234_s9 = scalar_lea.hbm %s3277_s0, %s2154_s29  ;;  %s227_s10 = scalar_lea.vmem [#allocation3], %s2036_s22 }
  0x2b   : > { %s235_s7 = sshll.u32 %s227_s10, 4  ;;  %p2942_p2 = pnand %p2568_p0, %p2919_p12  ;;  %s236_s7 = int_to_ptr.vmem [resolvable:$true] %s235_s7 }
  0x2c   : > { %s224_s8 = scalar_lea.sflag [#allocation4], %s223_s21  ;;  %s2703_s14 = scalar_lea.vmem %s236_s7, 4096 }
  0x2d   : > { %p2692_p3 = pneg %p2942_p2  ;;  %p2704_p5 = scmp.ne.s32.totalorder %s236_s7, %s2703_s14 }
  0x2e   : > { %s2807_s11 = smov [#allocation3]  }
  0x2f   : > { %p2706_p7 = pnand %p2704_p5, %p2692_p3  ;;  %s2708_s1 = sshll.u32 %s2807_s11, 4  ;;  %s2709_s1 = int_to_ptr.vmem [resolvable:$false] %s2708_s1 }
  0x30   : > { %s2710_s29 = scalar_lea.vmem %s2709_s1, 8192  ;;  %p2711_p9 = scmp.lt.s32.totalorder %s236_s7, %s2709_s1 }
  0x31   : > { %p2707_p6 = pneg %p2706_p7  ;;  %p2712_p11 = scmp.lt.s32.totalorder %s2710_s29, %s2703_s14 }
  0x33   : > { %p2713_p10 = por %p2712_p11, %p2711_p9 }
  0x35   : > { %p2714_p13 = pnand %p2713_p10, %p2707_p6 }
  0x37   : > { %2717 = shalt.err (!%p2714_p13)
}
  0x38   : > { %s3296_s12 = smov 4   ;;  %s3297_s22 = smov 64  }
  0x39   : > { %2562 = dma.hbm_to_vmem [thread:$0]  (!%p2942_p2), %s234_s9, 4096, %s236_s7, %s224_s8, %s3297_s22, %s3297_s22, %s3296_s12  }
  0x3a   : > { %247 = sbr.rel (%p2890_p8) target bundleno = 401 (0x191), region = 36  ;;  %s2956_s21 = sand.u32 (!%p2890_p8), 1, %s2786_s16  }
  0x3b   : > { %s2040_s1 = sshll.u32 (!%p2890_p8), %s2956_s21, 8  ;;  %s250_s30 = scalar_lea.sflag (!%p2890_p8), [#allocation4], %s2956_s21 }
  0x3c   : > { %s2962_s6 = scalar_lea.vmem (!%p2890_p8), [#allocation3], %s2040_s1 }
  0x3f   : > { %2769 = dma.done.wait (%p2880_p4), %s250_s30, 4096  }
  0x40   : > { %2771 = vsyncadd (%p2880_p4), %s250_s30, 4294963200 }
  0x41   : > { %2773 = dma.done.wait (%p2870_p1), [#allocation7], 1024  }
  0x42   : > { %2775 = vsyncadd (%p2870_p1), [#allocation7], 4294966272  ;;  %v2624_v0 = vld [vmem:[#allocation6 + $0x38] sm:$0xff]   ;;  %v2625_v1 = vld [vmem:[#allocation6 + $0x30] sm:$0xff]   ;;  %s3036_s8 = scalar_lea.vmem [#allocation8], %s2040_s1  ;;  %s2219_s9 = sshll.u32 %s2794_s18, 12 }
  0x43   : > { %2451 = vmatprep.subr.bf16.mxu0 %v2624_v0  ;;  %2531 = vmatprep.subr.bf16.mxu1 %v2624_v0  ;;  %v2626_v2 = vld [vmem:[#allocation6 + $0x28] sm:$0xff]   ;;  %v2627_v3 = vld [vmem:[#allocation6 + $0x20] sm:$0xff]   ;;  %v2628_v6 = vld [vmem:[#allocation6 + $0x18] sm:$0xff]   ;;  %s1903_s10 = sshll.u32 %s3036_s8, 4  ;;  %s3227_s11 = scalar_lea.hbm %s3281_s4, %s2219_s9  ;;  %s3229_s10 = int_to_ptr.vmem [resolvable:$true] %s1903_s10 }
  0x44   : > { %2452 = vmatpush3.bf16.msra.mxu0 %v2624_v0  ;;  %2539 = vmatpush3.bf16.msra.mxu1 %v2624_v0  ;;  %v2632_v4 = vld [vmem:[%s2962_s6] sm:$0xff]   ;;  %v2629_v7 = vld [vmem:[#allocation6 + $0x10] sm:$0xff]   ;;  %v2630_v8 = vld [vmem:[#allocation6 + $0x8] sm:$0xff]   ;;  %s1889_s18 = scalar_lea.sflag [#allocation5], %s2956_s21  ;;  %s2718_s29 = scalar_lea.vmem %s3229_s10, 4096 }
  0x45   : > { %2453 = vmatprep.subr.bf16.mxu0 %v2625_v1  ;;  %2532 = vmatprep.subr.bf16.mxu1 %v2625_v1  ;;  %v2633_v5 = vld [vmem:[%s2962_s6 + $0x80] sm:$0xff]   ;;  %v2634_v10 = vld [vmem:[%s2962_s6 + $0x8] sm:$0xff]   ;;  %v2636_v12 = vld [vmem:[%s2962_s6 + $0x10] sm:$0xff]   ;;  %p2719_p1 = scmp.ne.s32.totalorder %s3229_s10, %s2718_s29  ;;  %p3298_p4 = scmp.ne.s32.totalorder %s3294_s13, 0 }
  0x46   : > { %2467 = vmatprep.mubr.bf16.mxu0 %v2632_v4  ;;  %2499 = vmatprep.mubr.bf16.mxu1 %v2633_v5  ;;  %v2631_v9 = vld [vmem:[#allocation6] sm:$0xff]   ;;  %v2635_v11 = vld [vmem:[%s2962_s6 + $0x88] sm:$0xff]   ;;  %v2637_v13 = vld [vmem:[%s2962_s6 + $0x90] sm:$0xff]   ;;  %s2808_s12 = smov [#allocation8]  }
  0x47   : > { %v2638_v14 = vld [vmem:[%s2962_s6 + $0x18] sm:$0xff]   ;;  %v2640_v16 = vld [vmem:[%s2962_s6 + $0x20] sm:$0xff]   ;;  %v2642_v18 = vld [vmem:[%s2962_s6 + $0x28] sm:$0xff]   ;;  %p2720_p8 = pnand %p2719_p1, %p3298_p4  ;;  %s2722_s22 = sshll.u32 %s2808_s12, 4  ;;  %s2723_s22 = int_to_ptr.vmem [resolvable:$false] %s2722_s22 }
  0x48   : > { %2454 = vmatpush3.bf16.msra.mxu0 %v2625_v1  ;;  %2540 = vmatpush3.bf16.msra.mxu1 %v2625_v1  ;;  %v2639_v15 = vld [vmem:[%s2962_s6 + $0x98] sm:$0xff]   ;;  %v2641_v17 = vld [vmem:[%s2962_s6 + $0xa0] sm:$0xff]   ;;  %v2643_v19 = vld [vmem:[%s2962_s6 + $0xa8] sm:$0xff]   ;;  %s2724_s1 = scalar_lea.vmem %s2723_s22, 8192  ;;  %p2725_p13 = scmp.lt.s32.totalorder %s3229_s10, %s2723_s22 }
  0x49   : > { %2455 = vmatprep.subr.bf16.mxu0 %v2626_v2  ;;  %2533 = vmatprep.subr.bf16.mxu1 %v2626_v2  ;;  %v2644_v20 = vld [vmem:[%s2962_s6 + $0x30] sm:$0xff]   ;;  %v2646_v22 = vld [vmem:[%s2962_s6 + $0x38] sm:$0xff]   ;;  %v2648_v24 = vld [vmem:[%s2962_s6 + $0x40] sm:$0xff]   ;;  %p2721_p12 = pneg %p2720_p8  ;;  %p2726_p0 = scmp.lt.s32.totalorder %s2724_s1, %s2718_s29 }
  0x4a   : > { %v2645_v21 = vld [vmem:[%s2962_s6 + $0xb0] sm:$0xff]   ;;  %v2647_v23 = vld [vmem:[%s2962_s6 + $0xb8] sm:$0xff]   ;;  %v2649_v25 = vld [vmem:[%s2962_s6 + $0xc0] sm:$0xff]  }
  0x4b   : > { %v2650_v26 = vld [vmem:[%s2962_s6 + $0x48] sm:$0xff]   ;;  %v2652_v28 = vld [vmem:[%s2962_s6 + $0x50] sm:$0xff]   ;;  %v2654_v30 = vld [vmem:[%s2962_s6 + $0x58] sm:$0xff]   ;;  %p2727_p2 = por %p2726_p0, %p2725_p13 }
  0x4c   : > { %2456 = vmatpush3.bf16.msra.mxu0 %v2626_v2  ;;  %2541 = vmatpush3.bf16.msra.mxu1 %v2626_v2  ;;  %v2651_v27 = vld [vmem:[%s2962_s6 + $0xc8] sm:$0xff]   ;;  %v2653_v29 = vld [vmem:[%s2962_s6 + $0xd0] sm:$0xff]   ;;  %v2655_v31 = vld [vmem:[%s2962_s6 + $0xd8] sm:$0xff]  }
  0x4d   : > { %2457 = vmatprep.subr.bf16.mxu0 %v2627_v3  ;;  %2534 = vmatprep.subr.bf16.mxu1 %v2627_v3  ;;  %v2656_v32 = vld [vmem:[%s2962_s6 + $0x60] sm:$0xff]   ;;  %v2658_v34 = vld [vmem:[%s2962_s6 + $0x68] sm:$0xff]   ;;  %v2660_v36 = vld [vmem:[%s2962_s6 + $0x70] sm:$0xff]   ;;  %p2728_p3 = pnand %p2727_p2, %p2721_p12 }
  0x4e   : > { %v2657_v33 = vld [vmem:[%s2962_s6 + $0xe0] sm:$0xff]   ;;  %v2659_v35 = vld [vmem:[%s2962_s6 + $0xe8] sm:$0xff]   ;;  %v2661_v37 = vld [vmem:[%s2962_s6 + $0xf0] sm:$0xff]  }
  0x4f   : > { %v2662_v38 = vld [vmem:[%s2962_s6 + $0x78] sm:$0xff]   ;;  %v3007_v40 = vld [vmem:[%s3279_s2] ss:$0 sm:$0xff] }
  0x50   : > { %2458 = vmatpush3.bf16.msra.mxu0 %v2627_v3  ;;  %2542 = vmatpush3.bf16.msra.mxu1 %v2627_v3  ;;  %v2663_v39 = vld [vmem:[%s2962_s6 + $0xf8] sm:$0xff]   ;;  %v3012_v42 = vld [vmem:[%s3280_s3] ss:$0 sm:$0xff] }
  0x51   : > { %2459 = vmatprep.subr.bf16.mxu0 %v2628_v6  ;;  %2535 = vmatprep.subr.bf16.mxu1 %v2628_v6 }
  0x54   : > { %2460 = vmatpush3.bf16.msra.mxu0 %v2628_v6  ;;  %2543 = vmatpush3.bf16.msra.mxu1 %v2628_v6 }
  0x55   : > { %2461 = vmatprep.subr.bf16.mxu0 %v2629_v7  ;;  %2536 = vmatprep.subr.bf16.mxu1 %v2629_v7 }
  0x58   : > { %2462 = vmatpush3.bf16.msra.mxu0 %v2629_v7  ;;  %2544 = vmatpush3.bf16.msra.mxu1 %v2629_v7 }
  0x59   : > { %2463 = vmatprep.subr.bf16.mxu0 %v2630_v8  ;;  %2537 = vmatprep.subr.bf16.mxu1 %v2630_v8 }
  0x5c   : > { %2464 = vmatpush3.bf16.msra.mxu0 %v2630_v8  ;;  %2545 = vmatpush3.bf16.msra.mxu1 %v2630_v8 }
  0x5d   : > { %2465 = vmatprep.subr.bf16.mxu0 %v2631_v9  ;;  %2538 = vmatprep.subr.bf16.mxu1 %v2631_v9 }
  0x60   : > { %2466 = vmatpush3.bf16.msra.mxu0 %v2631_v9  ;;  %2546 = vmatpush3.bf16.msra.mxu1 %v2631_v9 }
  0x63   : > { %2468 = vmatmul.mubr.bf16.vlgmr.msra.gmra.mxu0 %v2634_v10  ;;  %2500 = vmatmul.mubr.bf16.vlgmr.msra.gmra.mxu1 %v2635_v11 }
  0x64   : > { %2471 = vmatprep.mubr.bf16.mxu0 %v2636_v12  ;;  %2503 = vmatprep.mubr.bf16.mxu1 %v2637_v13 }
  0x6b   : > { %2472 = vmatmul.mubr.bf16.gmra.mxu0 %v2638_v14  ;;  %2504 = vmatmul.mubr.bf16.gmra.mxu1 %v2639_v15 }
  0x6c   : > { %2475 = vmatprep.mubr.bf16.mxu0 %v2640_v16  ;;  %2507 = vmatprep.mubr.bf16.mxu1 %v2641_v17 }
  0x73   : > { %2476 = vmatmul.mubr.bf16.gmra.mxu0 %v2642_v18  ;;  %2508 = vmatmul.mubr.bf16.gmra.mxu1 %v2643_v19 }
  0x74   : > { %2479 = vmatprep.mubr.bf16.mxu0 %v2644_v20  ;;  %2511 = vmatprep.mubr.bf16.mxu1 %v2645_v21 }
  0x7b   : > { %2480 = vmatmul.mubr.bf16.gmra.mxu0 %v2646_v22  ;;  %2512 = vmatmul.mubr.bf16.gmra.mxu1 %v2647_v23 }
  0x7c   : > { %2483 = vmatprep.mubr.bf16.mxu0 %v2648_v24  ;;  %2515 = vmatprep.mubr.bf16.mxu1 %v2649_v25 }
  0x83   : > { %2484 = vmatmul.mubr.bf16.gmra.mxu0 %v2650_v26  ;;  %2516 = vmatmul.mubr.bf16.gmra.mxu1 %v2651_v27 }
  0x84   : > { %2487 = vmatprep.mubr.bf16.mxu0 %v2652_v28  ;;  %2519 = vmatprep.mubr.bf16.mxu1 %v2653_v29 }
  0x8b   : > { %2488 = vmatmul.mubr.bf16.gmra.mxu0 %v2654_v30  ;;  %2520 = vmatmul.mubr.bf16.gmra.mxu1 %v2655_v31 }
  0x8c   : > { %2491 = vmatprep.mubr.bf16.mxu0 %v2656_v32  ;;  %2523 = vmatprep.mubr.bf16.mxu1 %v2657_v33 }
  0x93   : > { %2492 = vmatmul.mubr.bf16.gmra.mxu0 %v2658_v34  ;;  %2524 = vmatmul.mubr.bf16.gmra.mxu1 %v2659_v35 }
  0x94   : > { %2495 = vmatprep.mubr.bf16.mxu0 %v2660_v36  ;;  %2527 = vmatprep.mubr.bf16.mxu1 %v2661_v37 }
  0x9b   : > { %2496 = vmatmul.mubr.bf16.gmra.mxu0 %v2662_v38  ;;  %2528 = vmatmul.mubr.bf16.gmra.mxu1 %v2663_v39 }
 0x123   : > { %v2469_v41 = vpop.f32.mrf.mxu0  ;;  %v2501_v43 = vpop.f32.mrf.mxu1 }
 0x124   : > { %v1243_v44 = vmul.f32 %v2469_v41, %v3007_v40  ;;  %v1275_v45 = vmul.f32 %v2501_v43, %v3007_v40 }
 0x125   : > { %v784_v46 = vpop.f32.mrf.mxu0  ;;  %v912_v47 = vpop.f32.mrf.mxu1 }
 0x126   : > { %v1314_v48 = vadd.f32 %v3012_v42, %v1243_v44  ;;  %v1346_v49 = vadd.f32 %v3012_v42, %v1275_v45  ;;  %v1241_v50 = vmul.f32 %v3007_v40, %v784_v46  ;;  %v1273_v51 = vmul.f32 %v3007_v40, %v912_v47 }
 0x127   : > { %v2470_v52 = vpop.f32.mrf.mxu0  ;;  %v2502_v53 = vpop.f32.mrf.mxu1 }
 0x128   : > { %vm1378_vm0 = vcmp.gt.f32.partialorder %v1314_v48, 0.0  ;;  %v1442_v54 = vmul.f32 0.1, %v1314_v48  ;;  %vm1410_vm1 = vcmp.gt.f32.partialorder %v1346_v49, 0.0  ;;  %v1474_v55 = vmul.f32 0.1, %v1346_v49 }
 0x129   : > { %v1312_v56 = vadd.f32 %v3012_v42, %v1241_v50  ;;  %v1344_v57 = vadd.f32 %v3012_v42, %v1273_v51  ;;  %v1244_v58 = vmul.f32 %v2470_v52, %v3007_v40  ;;  %v1276_v59 = vmul.f32 %v2502_v53, %v3007_v40  ;;  %v787_v60 = vpop.f32.mrf.mxu0  ;;  %v915_v61 = vpop.f32.mrf.mxu1 }
 0x12a   : > { %v1506_v62 = vsel %vm1378_vm0, %v1314_v48, %v1442_v54  ;;  %v1538_v63 = vsel %vm1410_vm1, %v1346_v49, %v1474_v55  ;;  %v1242_v0 = vmul.f32 %v3007_v40, %v787_v60  ;;  %v1274_v1 = vmul.f32 %v3007_v40, %v915_v61 }
 0x12b   : > { %vm1376_vm2 = vcmp.gt.f32.partialorder %v1312_v56, 0.0  ;;  %v1440_v2 = vmul.f32 0.1, %v1312_v56  ;;  %vm1408_vm3 = vcmp.gt.f32.partialorder %v1344_v57, 0.0  ;;  %v1472_v3 = vmul.f32 0.1, %v1344_v57  ;;  %v2473_v4 = vpop.f32.mrf.mxu0  ;;  %v2505_v5 = vpop.f32.mrf.mxu1 }
 0x12c   : > { %v1315_v6 = vadd.f32 %v3012_v42, %v1244_v58  ;;  %v1347_v7 = vadd.f32 %v3012_v42, %v1276_v59  ;;  %v1313_v8 = vadd.f32 %v3012_v42, %v1242_v0  ;;  %v1345_v9 = vadd.f32 %v3012_v42, %v1274_v1 }
 0x12d   : > { %v1504_v10 = vsel %vm1376_vm2, %v1312_v56, %v1440_v2  ;;  %v1536_v11 = vsel %vm1408_vm3, %v1344_v57, %v1472_v3  ;;  %v1247_v12 = vmul.f32 %v2473_v4, %v3007_v40  ;;  %v1279_v13 = vmul.f32 %v2505_v5, %v3007_v40  ;;  %v800_v14 = vpop.f32.mrf.mxu0  ;;  %v928_v15 = vpop.f32.mrf.mxu1 }
 0x12e   : > { %vm1379_vm4 = vcmp.gt.f32.partialorder %v1315_v6, 0.0  ;;  %v1443_v16 = vmul.f32 0.1, %v1315_v6  ;;  %vm1411_vm5 = vcmp.gt.f32.partialorder %v1347_v7, 0.0  ;;  %v1475_v17 = vmul.f32 0.1, %v1347_v7 }
 0x12f   : > { %vm1377_vm6 = vcmp.gt.f32.partialorder %v1313_v8, 0.0  ;;  %v1441_v18 = vmul.f32 0.1, %v1313_v8  ;;  %vm1409_vm7 = vcmp.gt.f32.partialorder %v1345_v9, 0.0  ;;  %v1473_v19 = vmul.f32 0.1, %v1345_v9  ;;  %v2474_v20 = vpop.f32.mrf.mxu0  ;;  %v2506_v21 = vpop.f32.mrf.mxu1 }
 0x130   : > { %v1507_v22 = vsel %vm1379_vm4, %v1315_v6, %v1443_v16  ;;  %v1539_v23 = vsel %vm1411_vm5, %v1347_v7, %v1475_v17  ;;  %v1318_v24 = vadd.f32 %v3012_v42, %v1247_v12  ;;  %v1350_v25 = vadd.f32 %v3012_v42, %v1279_v13 }
 0x131   : > { %v2228_v26 = vpack.c.bf16 %v1507_v22, %v1506_v62  ;;  %v2308_v27 = vpack.c.bf16 %v1539_v23, %v1538_v63  ;;  %v1505_v28 = vsel %vm1377_vm6, %v1313_v8, %v1441_v18  ;;  %v1537_v29 = vsel %vm1409_vm7, %v1345_v9, %v1473_v19  ;;  %v803_v30 = vpop.f32.mrf.mxu0  ;;  %v931_v31 = vpop.f32.mrf.mxu1 }
 0x132   : > { %v2223_v32 = vpack.c.bf16 %v1505_v28, %v1504_v10  ;;  %v2303_v33 = vpack.c.bf16 %v1537_v29, %v1536_v11  ;;  %vm1382_vm8 = vcmp.gt.f32.partialorder %v1318_v24, 0.0  ;;  %v1446_v34 = vmul.f32 0.1, %v1318_v24 }
 0x133   : > { %2380 = vst [vmem:[%s3036_s8 + $0x8] sm:$0xff] %v2228_v26   ;;  %2396 = vst [vmem:[%s3036_s8 + $0x88] sm:$0xff] %v2308_v27   ;;  %vm1414_vm9 = vcmp.gt.f32.partialorder %v1350_v25, 0.0  ;;  %v1478_v35 = vmul.f32 0.1, %v1350_v25  ;;  %v1245_v36 = vmul.f32 %v3007_v40, %v800_v14  ;;  %v1277_v37 = vmul.f32 %v3007_v40, %v928_v15  ;;  %v2477_v38 = vpop.f32.mrf.mxu0  ;;  %v2509_v39 = vpop.f32.mrf.mxu1 }
 0x134   : > { %2224 = vst [vmem:[%s3036_s8] sm:$0xff] %v2223_v32   ;;  %2395 = vst [vmem:[%s3036_s8 + $0x80] sm:$0xff] %v2303_v33   ;;  %v1510_v41 = vsel %vm1382_vm8, %v1318_v24, %v1446_v34  ;;  %v1248_v43 = vmul.f32 %v2474_v20, %v3007_v40  ;;  %v1280_v44 = vmul.f32 %v2506_v21, %v3007_v40 }
 0x135   : > { %v1246_v45 = vmul.f32 %v3007_v40, %v803_v30  ;;  %v1542_v46 = vsel %vm1414_vm9, %v1350_v25, %v1478_v35  ;;  %v1316_v47 = vadd.f32 %v3012_v42, %v1245_v36  ;;  %v1348_v48 = vadd.f32 %v3012_v42, %v1277_v37  ;;  %v816_v50 = vpop.f32.mrf.mxu0  ;;  %v944_v51 = vpop.f32.mrf.mxu1 }
 0x136   : > { %v1278_v49 = vmul.f32 %v3007_v40, %v931_v31  ;;  %v1319_v52 = vadd.f32 %v3012_v42, %v1248_v43  ;;  %v1351_v53 = vadd.f32 %v3012_v42, %v1280_v44  ;;  %v1251_v55 = vmul.f32 %v2477_v38, %v3007_v40 }
 0x137   : > { %v1317_v54 = vadd.f32 %v3012_v42, %v1246_v45  ;;  %vm1380_vm10 = vcmp.gt.f32.partialorder %v1316_v47, 0.0  ;;  %v1444_v56 = vmul.f32 0.1, %v1316_v47  ;;  %vm1412_vm11 = vcmp.gt.f32.partialorder %v1348_v48, 0.0  ;;  %v2478_v58 = vpop.f32.mrf.mxu0  ;;  %v2510_v59 = vpop.f32.mrf.mxu1 }
 0x138   : > { %v1476_v57 = vmul.f32 0.1, %v1348_v48  ;;  %vm1383_vm12 = vcmp.gt.f32.partialorder %v1319_v52, 0.0  ;;  %v1447_v60 = vmul.f32 0.1, %v1319_v52  ;;  %vm1415_vm13 = vcmp.gt.f32.partialorder %v1351_v53, 0.0 }
 0x139   : > { %v1479_v61 = vmul.f32 0.1, %v1351_v53  ;;  %v1508_v62 = vsel %vm1380_vm10, %v1316_v47, %v1444_v56  ;;  %vm1381_vm14 = vcmp.gt.f32.partialorder %v1317_v54, 0.0  ;;  %v1445_v0 = vmul.f32 0.1, %v1317_v54  ;;  %v819_v1 = vpop.f32.mrf.mxu0  ;;  %v947_v2 = vpop.f32.mrf.mxu1 }
 0x13a   : > { %v1540_v63 = vsel %vm1412_vm11, %v1348_v48, %v1476_v57  ;;  %v1511_v3 = vsel %vm1383_vm12, %v1319_v52, %v1447_v60  ;;  %v1349_v5 = vadd.f32 %v3012_v42, %v1278_v49  ;;  %v1322_v6 = vadd.f32 %v3012_v42, %v1251_v55 }
 0x13b   : > { %v1543_v4 = vsel %vm1415_vm13, %v1351_v53, %v1479_v61  ;;  %v2238_v7 = vpack.c.bf16 %v1511_v3, %v1510_v41  ;;  %v1509_v9 = vsel %vm1381_vm14, %v1317_v54, %v1445_v0  ;;  %v1283_v10 = vmul.f32 %v2509_v39, %v3007_v40  ;;  %v2481_v11 = vpop.f32.mrf.mxu0  ;;  %v2513_v12 = vpop.f32.mrf.mxu1 }
 0x13c   : > { %v2318_v8 = vpack.c.bf16 %v1543_v4, %v1542_v46  ;;  %v2233_v13 = vpack.c.bf16 %v1509_v9, %v1508_v62  ;;  %vm1413_vm15 = vcmp.gt.f32.partialorder %v1349_v5, 0.0  ;;  %v1477_v14 = vmul.f32 0.1, %v1349_v5 }
 0x13d   : > { %vm1386_vm0 = vcmp.gt.f32.partialorder %v1322_v6, 0.0  ;;  %2382 = vst [vmem:[%s3036_s8 + $0x18] sm:$0xff] %v2238_v7   ;;  %v1450_v15 = vmul.f32 0.1, %v1322_v6  ;;  %v1354_v16 = vadd.f32 %v3012_v42, %v1283_v10  ;;  %v1249_v17 = vmul.f32 %v3007_v40, %v816_v50  ;;  %v832_v19 = vpop.f32.mrf.mxu0  ;;  %v960_v20 = vpop.f32.mrf.mxu1 }
 0x13e   : > { %2398 = vst [vmem:[%s3036_s8 + $0x98] sm:$0xff] %v2318_v8   ;;  %v1281_v18 = vmul.f32 %v3007_v40, %v944_v51  ;;  %2381 = vst [vmem:[%s3036_s8 + $0x10] sm:$0xff] %v2233_v13   ;;  %v1541_v21 = vsel %vm1413_vm15, %v1349_v5, %v1477_v14  ;;  %v1252_v22 = vmul.f32 %v2478_v58, %v3007_v40 }
 0x13f   : > { %v1284_v23 = vmul.f32 %v2510_v59, %v3007_v40  ;;  %v1250_v24 = vmul.f32 %v3007_v40, %v819_v1  ;;  %v2313_v25 = vpack.c.bf16 %v1541_v21, %v1540_v63  ;;  %v1514_v26 = vsel %vm1386_vm0, %v1322_v6, %v1450_v15  ;;  %v2482_v28 = vpop.f32.mrf.mxu0  ;;  %v2514_v29 = vpop.f32.mrf.mxu1 }
 0x140   : > { %vm1418_vm1 = vcmp.gt.f32.partialorder %v1354_v16, 0.0  ;;  %v1482_v27 = vmul.f32 0.1, %v1354_v16  ;;  %v1320_v30 = vadd.f32 %v3012_v42, %v1249_v17  ;;  %v1352_v31 = vadd.f32 %v3012_v42, %v1281_v18 }
 0x141   : > { %v1323_v32 = vadd.f32 %v3012_v42, %v1252_v22  ;;  %v1355_v33 = vadd.f32 %v3012_v42, %v1284_v23  ;;  %2397 = vst [vmem:[%s3036_s8 + $0x90] sm:$0xff] %v2313_v25   ;;  %v1321_v35 = vadd.f32 %v3012_v42, %v1250_v24  ;;  %v1282_v36 = vmul.f32 %v3007_v40, %v947_v2  ;;  %v835_v38 = vpop.f32.mrf.mxu0  ;;  %v963_v39 = vpop.f32.mrf.mxu1 }
 0x142   : > { %v1546_v34 = vsel %vm1418_vm1, %v1354_v16, %v1482_v27  ;;  %v1255_v37 = vmul.f32 %v2481_v11, %v3007_v40  ;;  %vm1384_vm2 = vcmp.gt.f32.partialorder %v1320_v30, 0.0  ;;  %v1448_v41 = vmul.f32 0.1, %v1320_v30 }
 0x143   : > { %vm1416_vm3 = vcmp.gt.f32.partialorder %v1352_v31, 0.0  ;;  %v1480_v43 = vmul.f32 0.1, %v1352_v31  ;;  %vm1387_vm4 = vcmp.gt.f32.partialorder %v1323_v32, 0.0  ;;  %v1451_v44 = vmul.f32 0.1, %v1323_v32  ;;  %v2485_v46 = vpop.f32.mrf.mxu0  ;;  %v3074_v47 = vpop.f32.mrf.mxu1 }
 0x144   : > { %vm1419_vm5 = vcmp.gt.f32.partialorder %v1355_v33, 0.0  ;;  %v1483_v45 = vmul.f32 0.1, %v1355_v33  ;;  %v1512_v48 = vsel %vm1384_vm2, %v1320_v30, %v1448_v41  ;;  %vm1385_vm6 = vcmp.gt.f32.partialorder %v1321_v35, 0.0 }
 0x145   : > { %v1544_v49 = vsel %vm1416_vm3, %v1352_v31, %v1480_v43  ;;  %v1449_v50 = vmul.f32 0.1, %v1321_v35  ;;  %v1515_v51 = vsel %vm1387_vm4, %v1323_v32, %v1451_v44  ;;  %v1353_v53 = vadd.f32 %v3012_v42, %v1282_v36  ;;  %v3078_v55 = vpop.f32.mrf.mxu0  ;;  %v3080_v56 = vpop.f32.mrf.mxu1 }
 0x146   : > { %v1547_v52 = vsel %vm1419_vm5, %v1355_v33, %v1483_v45  ;;  %v1326_v54 = vadd.f32 %v3012_v42, %v1255_v37  ;;  %v2248_v57 = vpack.c.bf16 %v1515_v51, %v1514_v26  ;;  %v1287_v60 = vmul.f32 %v2513_v12, %v3007_v40 }
 0x147   : > { %v2328_v58 = vpack.c.bf16 %v1547_v52, %v1546_v34  ;;  %v1513_v59 = vsel %vm1385_vm6, %v1321_v35, %v1449_v50  ;;  %vm1417_vm7 = vcmp.gt.f32.partialorder %v1353_v53, 0.0  ;;  %v1481_v62 = vmul.f32 0.1, %v1353_v53  ;;  %v3083_v63 = vpop.f32.mrf.mxu0  ;;  %v3085_v0 = vpop.f32.mrf.mxu1 }
 0x148   : > { %v2243_v61 = vpack.c.bf16 %v1513_v59, %v1512_v48  ;;  %vm1390_vm8 = vcmp.gt.f32.partialorder %v1326_v54, 0.0  ;;  %2384 = vst [vmem:[%s3036_s8 + $0x28] sm:$0xff] %v2248_v57   ;;  %v1454_v1 = vmul.f32 0.1, %v1326_v54  ;;  %v1358_v2 = vadd.f32 %v3012_v42, %v1287_v60 }
 0x149   : > { %2400 = vst [vmem:[%s3036_s8 + $0xa8] sm:$0xff] %v2328_v58   ;;  %v1253_v3 = vmul.f32 %v3007_v40, %v832_v19  ;;  %v1285_v4 = vmul.f32 %v3007_v40, %v960_v20  ;;  %v1545_v5 = vsel %vm1417_vm7, %v1353_v53, %v1481_v62  ;;  %v1256_v6 = vmul.f32 %v2482_v28, %v3007_v40  ;;  %v851_v9 = vpop.f32.mrf.mxu0  ;;  %v3096_v10 = vpop.f32.mrf.mxu1 }
 0x14a   : > { %2383 = vst [vmem:[%s3036_s8 + $0x20] sm:$0xff] %v2243_v61   ;;  %v1288_v7 = vmul.f32 %v2514_v29, %v3007_v40  ;;  %v1254_v8 = vmul.f32 %v3007_v40, %v835_v38  ;;  %v2323_v11 = vpack.c.bf16 %v1545_v5, %v1544_v49  ;;  %v1518_v12 = vsel %vm1390_vm8, %v1326_v54, %v1454_v1 }
 0x14b   : > { %vm1422_vm9 = vcmp.gt.f32.partialorder %v1358_v2, 0.0  ;;  %v1486_v13 = vmul.f32 0.1, %v1358_v2  ;;  %v1324_v14 = vadd.f32 %v3012_v42, %v1253_v3  ;;  %v1356_v15 = vadd.f32 %v3012_v42, %v1285_v4  ;;  %v2489_v18 = vpop.f32.mrf.mxu0  ;;  %v3103_v19 = vpop.f32.mrf.mxu1 }
 0x14c   : > { %v1327_v16 = vadd.f32 %v3012_v42, %v1256_v6  ;;  %v1359_v17 = vadd.f32 %v3012_v42, %v1288_v7  ;;  %2399 = vst [vmem:[%s3036_s8 + $0xa0] sm:$0xff] %v2323_v11   ;;  %v1325_v21 = vadd.f32 %v3012_v42, %v1254_v8  ;;  %v1286_v22 = vmul.f32 %v3007_v40, %v963_v39 }
 0x14d   : > { %v1550_v20 = vsel %vm1422_vm9, %v1358_v2, %v1486_v13  ;;  %v1259_v23 = vmul.f32 %v2485_v46, %v3007_v40  ;;  %vm1388_vm10 = vcmp.gt.f32.partialorder %v1324_v14, 0.0  ;;  %v1452_v24 = vmul.f32 0.1, %v1324_v14  ;;  %v3109_v26 = vpop.f32.mrf.mxu0  ;;  %v3111_v27 = vpop.f32.mrf.mxu1 }
 0x14e   : > { %vm1420_vm11 = vcmp.gt.f32.partialorder %v1356_v15, 0.0  ;;  %v1484_v25 = vmul.f32 0.1, %v1356_v15  ;;  %vm1391_vm12 = vcmp.gt.f32.partialorder %v1327_v16, 0.0  ;;  %v1455_v28 = vmul.f32 0.1, %v1327_v16 }
 0x14f   : > { %vm1423_vm13 = vcmp.gt.f32.partialorder %v1359_v17, 0.0  ;;  %v1487_v29 = vmul.f32 0.1, %v1359_v17  ;;  %v1516_v30 = vsel %vm1388_vm10, %v1324_v14, %v1452_v24  ;;  %vm1389_vm14 = vcmp.gt.f32.partialorder %v1325_v21, 0.0  ;;  %v3113_v33 = vpop.f32.mrf.mxu0  ;;  %v3119_v44 = vpop.f32.mrf.mxu1 }
 0x150   : > { %v1548_v31 = vsel %vm1420_vm11, %v1356_v15, %v1484_v25  ;;  %v1453_v32 = vmul.f32 0.1, %v1325_v21  ;;  %v1519_v34 = vsel %vm1391_vm12, %v1327_v16, %v1455_v28  ;;  %v1357_v36 = vadd.f32 %v3012_v42, %v1286_v22 }
 0x151   : > { %v1551_v35 = vsel %vm1423_vm13, %v1359_v17, %v1487_v29  ;;  %v1330_v37 = vadd.f32 %v3012_v42, %v1259_v23  ;;  %v2258_v38 = vpack.c.bf16 %v1519_v34, %v1518_v12  ;;  %v1291_v43 = vmul.f32 %v3074_v47, %v3007_v40  ;;  %v3121_v48 = vpop.f32.mrf.mxu0  ;;  %v995_v61 = vpop.f32.mrf.mxu1 }
 0x152   : > { %v2338_v39 = vpack.c.bf16 %v1551_v35, %v1550_v20  ;;  %v1517_v41 = vsel %vm1389_vm14, %v1325_v21, %v1453_v32  ;;  %vm1421_vm15 = vcmp.gt.f32.partialorder %v1357_v36, 0.0  ;;  %v1485_v46 = vmul.f32 0.1, %v1357_v36 }
 0x153   : > { %v2253_v45 = vpack.c.bf16 %v1517_v41, %v1516_v30  ;;  %vm1394_vm0 = vcmp.gt.f32.partialorder %v1330_v37, 0.0  ;;  %2386 = vst [vmem:[%s3036_s8 + $0x38] sm:$0xff] %v2258_v38   ;;  %v1458_v49 = vmul.f32 0.1, %v1330_v37  ;;  %v1362_v50 = vadd.f32 %v3012_v42, %v1291_v43  ;;  %v2493_v2 = vpop.f32.mrf.mxu0 }
 0x154   : > { %2402 = vst [vmem:[%s3036_s8 + $0xb8] sm:$0xff] %v2338_v39   ;;  %v1257_v51 = vmul.f32 %v3007_v40, %v3078_v55  ;;  %v1289_v52 = vmul.f32 %v3007_v40, %v3080_v56  ;;  %v1549_v47 = vsel %vm1421_vm15, %v1357_v36, %v1485_v46  ;;  %v1260_v53 = vmul.f32 %v3083_v63, %v3007_v40 }
 0x155   : > { %2385 = vst [vmem:[%s3036_s8 + $0x30] sm:$0xff] %v2253_v45   ;;  %v1292_v54 = vmul.f32 %v3085_v0, %v3007_v40  ;;  %v1258_v57 = vmul.f32 %v3007_v40, %v851_v9  ;;  %v2333_v58 = vpack.c.bf16 %v1549_v47, %v1548_v31  ;;  %v1522_v59 = vsel %vm1394_vm0, %v1330_v37, %v1458_v49  ;;  %v3145_v9 = vpop.f32.mrf.mxu1  ;;  %v3147_v14 = vpop.f32.mrf.mxu0 }
 0x156   : > { %vm1426_vm1 = vcmp.gt.f32.partialorder %v1362_v50, 0.0  ;;  %v1490_v60 = vmul.f32 0.1, %v1362_v50  ;;  %v1328_v55 = vadd.f32 %v3012_v42, %v1257_v51  ;;  %v1360_v56 = vadd.f32 %v3012_v42, %v1289_v52 }
 0x157   : > { %v1331_v62 = vadd.f32 %v3012_v42, %v1260_v53  ;;  %v1363_v1 = vadd.f32 %v3012_v42, %v1292_v54  ;;  %2401 = vst [vmem:[%s3036_s8 + $0xb0] sm:$0xff] %v2333_v58   ;;  %v1329_v0 = vadd.f32 %v3012_v42, %v1258_v57  ;;  %v1290_v3 = vmul.f32 %v3007_v40, %v3096_v10  ;;  %v1008_v25 = vpop.f32.mrf.mxu1  ;;  %v2494_v32 = vpop.f32.mrf.mxu0 }
 0x158   : > { %v1554_v63 = vsel %vm1426_vm1, %v1362_v50, %v1490_v60  ;;  %v1263_v4 = vmul.f32 %v2489_v18, %v3007_v40  ;;  %vm1392_vm2 = vcmp.gt.f32.partialorder %v1328_v55, 0.0  ;;  %v1456_v5 = vmul.f32 0.1, %v1328_v55 }
 0x159   : > { %vm1424_vm3 = vcmp.gt.f32.partialorder %v1360_v56, 0.0  ;;  %v1488_v6 = vmul.f32 0.1, %v1360_v56  ;;  %vm1395_vm4 = vcmp.gt.f32.partialorder %v1331_v62, 0.0  ;;  %v1459_v7 = vmul.f32 0.1, %v1331_v62  ;;  %v2526_v45 = vpop.f32.mrf.mxu1  ;;  %v883_v49 = vpop.f32.mrf.mxu0 }
 0x15a   : > { %vm1427_vm5 = vcmp.gt.f32.partialorder %v1363_v1, 0.0  ;;  %v1491_v8 = vmul.f32 0.1, %v1363_v1  ;;  %v1520_v11 = vsel %vm1392_vm2, %v1328_v55, %v1456_v5  ;;  %vm1393_vm6 = vcmp.gt.f32.partialorder %v1329_v0, 0.0 }
 0x15b   : > { %v1552_v12 = vsel %vm1424_vm3, %v1360_v56, %v1488_v6  ;;  %v1457_v13 = vmul.f32 0.1, %v1329_v0  ;;  %v1523_v10 = vsel %vm1395_vm4, %v1331_v62, %v1459_v7  ;;  %v1361_v16 = vadd.f32 %v3012_v42, %v1290_v3  ;;  %v1011_v58 = vpop.f32.mrf.mxu1  ;;  %v2497_v56 = vpop.f32.mrf.mxu0 }
 0x15c   : > { %v1555_v15 = vsel %vm1427_vm5, %v1363_v1, %v1491_v8  ;;  %v1334_v17 = vadd.f32 %v3012_v42, %v1263_v4  ;;  %v2268_v18 = vpack.c.bf16 %v1523_v10, %v1522_v59  ;;  %v1295_v22 = vmul.f32 %v3103_v19, %v3007_v40 }
 0x15d   : > { %v2348_v20 = vpack.c.bf16 %v1555_v15, %v1554_v63  ;;  %v1521_v21 = vsel %vm1393_vm6, %v1329_v0, %v1457_v13  ;;  %vm1425_vm7 = vcmp.gt.f32.partialorder %v1361_v16, 0.0  ;;  %v1489_v24 = vmul.f32 0.1, %v1361_v16  ;;  %v2529_v8 = vpop.f32.mrf.mxu1  ;;  %v896_v10 = vpop.f32.mrf.mxu0 }
 0x15e   : > { %v2263_v23 = vpack.c.bf16 %v1521_v21, %v1520_v11  ;;  %vm1398_vm8 = vcmp.gt.f32.partialorder %v1334_v17, 0.0  ;;  %2388 = vst [vmem:[%s3036_s8 + $0x48] sm:$0xff] %v2268_v18   ;;  %v1462_v28 = vmul.f32 0.1, %v1334_v17  ;;  %v1366_v29 = vadd.f32 %v3012_v42, %v1295_v22 }
 0x15f   : > { %2404 = vst [vmem:[%s3036_s8 + $0xc8] sm:$0xff] %v2348_v20   ;;  %v1261_v30 = vmul.f32 %v3007_v40, %v3109_v26  ;;  %v1293_v31 = vmul.f32 %v3007_v40, %v3111_v27  ;;  %v1553_v19 = vsel %vm1425_vm7, %v1361_v16, %v1489_v24  ;;  %v1264_v34 = vmul.f32 %v3113_v33, %v3007_v40 }
 0x160   : > { %2387 = vst [vmem:[%s3036_s8 + $0x40] sm:$0xff] %v2263_v23   ;;  %v1296_v35 = vmul.f32 %v3119_v44, %v3007_v40  ;;  %v1262_v36 = vmul.f32 %v3007_v40, %v3121_v48  ;;  %v2343_v37 = vpack.c.bf16 %v1553_v19, %v1552_v12  ;;  %v1526_v38 = vsel %vm1398_vm8, %v1334_v17, %v1462_v28 }
 0x161   : > { %vm1430_vm9 = vcmp.gt.f32.partialorder %v1366_v29, 0.0  ;;  %v1494_v26 = vmul.f32 0.1, %v1366_v29  ;;  %v1332_v39 = vadd.f32 %v3012_v42, %v1261_v30  ;;  %v1364_v27 = vadd.f32 %v3012_v42, %v1293_v31  ;;  %v2498_v31 = vpop.f32.mrf.mxu0 }
 0x162   : > { %v1335_v41 = vadd.f32 %v3012_v42, %v1264_v34  ;;  %v1367_v43 = vadd.f32 %v3012_v42, %v1296_v35  ;;  %2403 = vst [vmem:[%s3036_s8 + $0xc0] sm:$0xff] %v2343_v37   ;;  %v1333_v44 = vadd.f32 %v3012_v42, %v1262_v36  ;;  %v1294_v46 = vmul.f32 %v3007_v40, %v995_v61 }
 0x163   : > { %v1558_v33 = vsel %vm1430_vm9, %v1366_v29, %v1494_v26  ;;  %v1267_v48 = vmul.f32 %v2493_v2, %v3007_v40  ;;  %vm1396_vm10 = vcmp.gt.f32.partialorder %v1332_v39, 0.0  ;;  %v1460_v50 = vmul.f32 0.1, %v1332_v39 }
 0x164   : > { %vm1428_vm11 = vcmp.gt.f32.partialorder %v1364_v27, 0.0  ;;  %v1492_v51 = vmul.f32 0.1, %v1364_v27  ;;  %vm1399_vm12 = vcmp.gt.f32.partialorder %v1335_v41, 0.0  ;;  %v1463_v52 = vmul.f32 0.1, %v1335_v41 }
 0x165   : > { %vm1431_vm13 = vcmp.gt.f32.partialorder %v1367_v43, 0.0  ;;  %v1495_v47 = vmul.f32 0.1, %v1367_v43  ;;  %v1524_v53 = vsel %vm1396_vm10, %v1332_v39, %v1460_v50  ;;  %vm1397_vm14 = vcmp.gt.f32.partialorder %v1333_v44, 0.0 }
 0x166   : > { %v1556_v54 = vsel %vm1428_vm11, %v1364_v27, %v1492_v51  ;;  %v1461_v57 = vmul.f32 0.1, %v1333_v44  ;;  %v1527_v59 = vsel %vm1399_vm12, %v1335_v41, %v1463_v52  ;;  %v1365_v61 = vadd.f32 %v3012_v42, %v1294_v46 }
 0x167   : > { %v1559_v60 = vsel %vm1431_vm13, %v1367_v43, %v1495_v47  ;;  %v1338_v55 = vadd.f32 %v3012_v42, %v1267_v48  ;;  %v2278_v62 = vpack.c.bf16 %v1527_v59, %v1526_v38  ;;  %v1299_v63 = vmul.f32 %v3145_v9, %v3007_v40 }
 0x168   : > { %v2358_v1 = vpack.c.bf16 %v1559_v60, %v1558_v33  ;;  %v1525_v2 = vsel %vm1397_vm14, %v1333_v44, %v1461_v57  ;;  %vm1429_vm15 = vcmp.gt.f32.partialorder %v1365_v61, 0.0  ;;  %v1493_v3 = vmul.f32 0.1, %v1365_v61  ;;  %v899_v33 = vpop.f32.mrf.mxu0 }
 0x169   : > { %v2273_v0 = vpack.c.bf16 %v1525_v2, %v1524_v53  ;;  %vm1402_vm0 = vcmp.gt.f32.partialorder %v1338_v55, 0.0  ;;  %2390 = vst [vmem:[%s3036_s8 + $0x58] sm:$0xff] %v2278_v62   ;;  %v1466_v4 = vmul.f32 0.1, %v1338_v55  ;;  %v1370_v5 = vadd.f32 %v3012_v42, %v1299_v63 }
 0x16a   : > { %2406 = vst [vmem:[%s3036_s8 + $0xd8] sm:$0xff] %v2358_v1   ;;  %v1265_v6 = vmul.f32 %v3007_v40, %v3147_v14  ;;  %v1297_v7 = vmul.f32 %v3007_v40, %v1008_v25  ;;  %v1557_v11 = vsel %vm1429_vm15, %v1365_v61, %v1493_v3  ;;  %v1268_v9 = vmul.f32 %v2494_v32, %v3007_v40  ;;  %v1024_v25 = vpop.f32.mrf.mxu1 }
 0x16b   : > { %2389 = vst [vmem:[%s3036_s8 + $0x50] sm:$0xff] %v2273_v0   ;;  %v1300_v12 = vmul.f32 %v2526_v45, %v3007_v40  ;;  %v1266_v13 = vmul.f32 %v3007_v40, %v883_v49  ;;  %v2353_v15 = vpack.c.bf16 %v1557_v11, %v1556_v54  ;;  %vm1434_vm1 = vcmp.gt.f32.partialorder %v1370_v5, 0.0 }
 0x16c   : > { %v1498_v16 = vmul.f32 0.1, %v1370_v5  ;;  %v1336_v17 = vadd.f32 %v3012_v42, %v1265_v6  ;;  %v1368_v14 = vadd.f32 %v3012_v42, %v1297_v7  ;;  %v1339_v18 = vadd.f32 %v3012_v42, %v1268_v9  ;;  %v2530_v39 = vpop.f32.mrf.mxu1 }
 0x16d   : > { %v1371_v20 = vadd.f32 %v3012_v42, %v1300_v12  ;;  %2405 = vst [vmem:[%s3036_s8 + $0xd0] sm:$0xff] %v2353_v15   ;;  %v1530_v21 = vsel %vm1402_vm0, %v1338_v55, %v1466_v4  ;;  %v1337_v22 = vadd.f32 %v3012_v42, %v1266_v13  ;;  %v1298_v23 = vmul.f32 %v3007_v40, %v1011_v58 }
 0x16e   : > { %v1271_v24 = vmul.f32 %v2497_v56, %v3007_v40  ;;  %v1562_v28 = vsel %vm1434_vm1, %v1370_v5, %v1498_v16  ;;  %vm1400_vm2 = vcmp.gt.f32.partialorder %v1336_v17, 0.0  ;;  %v1464_v29 = vmul.f32 0.1, %v1336_v17  ;;  %v1027_v58 = vpop.f32.mrf.mxu1 }
 0x16f   : > { %v1496_v30 = vmul.f32 0.1, %v1368_v14  ;;  %vm1403_vm3 = vcmp.gt.f32.partialorder %v1339_v18, 0.0  ;;  %v1467_v32 = vmul.f32 0.1, %v1339_v18  ;;  %vm1435_vm4 = vcmp.gt.f32.partialorder %v1371_v20, 0.0 }
 0x170   : > { %v1499_v19 = vmul.f32 0.1, %v1371_v20  ;;  %v1528_v34 = vsel %vm1400_vm2, %v1336_v17, %v1464_v29  ;;  %vm1432_vm5 = vcmp.gt.f32.partialorder %v1368_v14, 0.0  ;;  %vm1401_vm6 = vcmp.gt.f32.partialorder %v1337_v22, 0.0 }
 0x171   : > { %v1465_v35 = vmul.f32 0.1, %v1337_v22  ;;  %v1531_v36 = vsel %vm1403_vm3, %v1339_v18, %v1467_v32  ;;  %v1369_v38 = vadd.f32 %v3012_v42, %v1298_v23  ;;  %v1342_v26 = vadd.f32 %v3012_v42, %v1271_v24 }
 0x172   : > { %v1563_v37 = vsel %vm1435_vm4, %v1371_v20, %v1499_v19  ;;  %v2288_v27 = vpack.c.bf16 %v1531_v36, %v1530_v21  ;;  %v1303_v45 = vmul.f32 %v2529_v8, %v3007_v40  ;;  %v1560_v44 = vsel %vm1432_vm5, %v1368_v14, %v1496_v30 }
 0x173   : > { %v2368_v41 = vpack.c.bf16 %v1563_v37, %v1562_v28  ;;  %v1529_v43 = vsel %vm1401_vm6, %v1337_v22, %v1465_v35  ;;  %vm1433_vm7 = vcmp.gt.f32.partialorder %v1369_v38, 0.0  ;;  %v1497_v48 = vmul.f32 0.1, %v1369_v38 }
 0x174   : > { %v2283_v46 = vpack.c.bf16 %v1529_v43, %v1528_v34  ;;  %2392 = vst [vmem:[%s3036_s8 + $0x68] sm:$0xff] %v2288_v27   ;;  %v1470_v49 = vmul.f32 0.1, %v1342_v26  ;;  %v1374_v50 = vadd.f32 %v3012_v42, %v1303_v45  ;;  %v1269_v51 = vmul.f32 %v3007_v40, %v896_v10 }
 0x175   : > { %2408 = vst [vmem:[%s3036_s8 + $0xe8] sm:$0xff] %v2368_v41   ;;  %v1301_v52 = vmul.f32 %v3007_v40, %v1024_v25  ;;  %v1561_v47 = vsel %vm1433_vm7, %v1369_v38, %v1497_v48  ;;  %v1272_v53 = vmul.f32 %v2498_v31, %v3007_v40  ;;  %v1304_v54 = vmul.f32 %v2530_v39, %v3007_v40 }
 0x176   : > { %2391 = vst [vmem:[%s3036_s8 + $0x60] sm:$0xff] %v2283_v46   ;;  %v1270_v57 = vmul.f32 %v3007_v40, %v899_v33  ;;  %v2363_v59 = vpack.c.bf16 %v1561_v47, %v1560_v44  ;;  %vm1406_vm8 = vcmp.gt.f32.partialorder %v1342_v26, 0.0  ;;  %v1502_v60 = vmul.f32 0.1, %v1374_v50 }
 0x177   : > { %v1340_v61 = vadd.f32 %v3012_v42, %v1269_v51  ;;  %v1372_v55 = vadd.f32 %v3012_v42, %v1301_v52  ;;  %v1343_v56 = vadd.f32 %v3012_v42, %v1272_v53  ;;  %v1375_v62 = vadd.f32 %v3012_v42, %v1304_v54 }
 0x178   : > { %2407 = vst [vmem:[%s3036_s8 + $0xe0] sm:$0xff] %v2363_v59   ;;  %vm1438_vm9 = vcmp.gt.f32.partialorder %v1374_v50, 0.0  ;;  %v1341_v1 = vadd.f32 %v3012_v42, %v1270_v57  ;;  %v1302_v2 = vmul.f32 %v3007_v40, %v1027_v58  ;;  %v1534_v63 = vsel %vm1406_vm8, %v1342_v26, %v1470_v49 }
 0x179   : > { %vm1404_vm10 = vcmp.gt.f32.partialorder %v1340_v61, 0.0  ;;  %v1468_v0 = vmul.f32 0.1, %v1340_v61  ;;  %vm1407_vm11 = vcmp.gt.f32.partialorder %v1343_v56, 0.0  ;;  %v1471_v3 = vmul.f32 0.1, %v1343_v56 }
 0x17a   : > { %vm1439_vm12 = vcmp.gt.f32.partialorder %v1375_v62, 0.0  ;;  %v1503_v4 = vmul.f32 0.1, %v1375_v62  ;;  %v1566_v5 = vsel %vm1438_vm9, %v1374_v50, %v1502_v60  ;;  %vm1436_vm13 = vcmp.gt.f32.partialorder %v1372_v55, 0.0 }
 0x17b   : > { %vm1405_vm14 = vcmp.gt.f32.partialorder %v1341_v1, 0.0  ;;  %v1469_v6 = vmul.f32 0.1, %v1341_v1  ;;  %v1500_v7 = vmul.f32 0.1, %v1372_v55  ;;  %v1535_v8 = vsel %vm1407_vm11, %v1343_v56, %v1471_v3 }
 0x17c   : > { %v1567_v11 = vsel %vm1439_vm12, %v1375_v62, %v1503_v4  ;;  %v1373_v40 = vadd.f32 %v3012_v42, %v1302_v2  ;;  %v1532_v9 = vsel %vm1404_vm10, %v1340_v61, %v1468_v0  ;;  %v2298_v12 = vpack.c.bf16 %v1535_v8, %v1534_v63 }
 0x17d   : > { %v2378_v13 = vpack.c.bf16 %v1567_v11, %v1566_v5  ;;  %v1533_v10 = vsel %vm1405_vm14, %v1341_v1, %v1469_v6  ;;  %v1564_v17 = vsel %vm1436_vm13, %v1372_v55, %v1500_v7 }
 0x17e   : > { %v2293_v15 = vpack.c.bf16 %v1533_v10, %v1532_v9  ;;  %vm1437_vm15 = vcmp.gt.f32.partialorder %v1373_v40, 0.0  ;;  %v1501_v16 = vmul.f32 0.1, %v1373_v40  ;;  %2394 = vst [vmem:[%s3036_s8 + $0x78] sm:$0xff] %v2298_v12  }
 0x17f   : > { %2410 = vst [vmem:[%s3036_s8 + $0xf8] sm:$0xff] %v2378_v13  }
 0x180   : > { %2393 = vst [vmem:[%s3036_s8 + $0x70] sm:$0xff] %v2293_v15   ;;  %v1565_v14 = vsel %vm1437_vm15, %v1373_v40, %v1501_v16 }
 0x181   : > { %v2373_v42 = vpack.c.bf16 %v1565_v14, %v1564_v17 }
 0x183   : > { %2409 = vst [vmem:[%s3036_s8 + $0xf0] sm:$0xff] %v2373_v42  }
 0x184   : > { %2731 = shalt.err (!%p2728_p3)
}
 0x185   : > { %s2732_s30 = scalar_lea.hbm %s3227_s11, 4096  ;;  %s2736_s25 = scalar_lea.hbm %s3281_s4, 16384 }
 0x186   : > { %p2733_p5 = scmp.ne.s32.totalorder %s3227_s11, %s2732_s30  ;;  %p2737_p9 = scmp.lt.s32.totalorder %s3227_s11, %s3281_s4 }
 0x187   : > { %p2738_p11 = scmp.lt.s32.totalorder %s2736_s25, %s2732_s30 }
 0x188   : > { %p2734_p7 = pnand %p2733_p5, %p3298_p4 }
 0x189   : > { %p2739_p10 = por %p2738_p11, %p2737_p9 }
 0x18a   : > { %p2735_p6 = pneg %p2734_p7 }
 0x18c   : > { %p2740_p1 = pnand %p2739_p10, %p2735_p6 }
 0x18e   : > { %2743 = shalt.err (!%p2740_p1)
}
 0x18f   : > { %s2809_s8 = smov 64   ;;  %s2810_s9 = smov 4  }
 0x190   : > { %2553 = dma.vmem_to_hbm [thread:$0]  (%p3298_p4), %s3229_s10, 4096, %s3227_s11, %s1889_s18, %s2809_s8, %s2809_s8, %s2810_s9  }
 0x191 PF: > { %p2570_p8 = scmp.ge.s32.totalorder %s2802_s20, 2  ;;  %s1918_s24 = sand.u32 1, %s2782_s15  }
 0x192   : > { %p3299_p12 = scmp.ne.s32.totalorder %s3289_s26, 0  ;;  %s1919_s14 = scalar_lea.sflag [#allocation5], %s1918_s24 }
 0x194   : > { %p2564_p13 = pnand %p2570_p8, %p3299_p12 }
 0x196   : > { %p2565_p0 = pneg %p2564_p13 }
 0x198   : > { %2777 = dma.done.wait (%p2565_p0), %s1919_s14, 4096  }
 0x199   : > { %2779 = vsyncadd (%p2565_p0), %s1919_s14, 4294963200  ;;  %s21_s20 = sadd.s32 1, %s2802_s20   ;;  %s3300_s15 = smov %s2786_s16 }
 0x19a   : > { %p18_p2 = scmp.ge.s32.totalorder %s21_s20, 6   ;;  %s3301_s16 = smov %s2790_s17 }
 0x19b   : > { %s3302_s17 = smov %s2934_s28  ;;  %s3303_s18 = smov %s2798_s19 }
 0x19c   : > { %s3304_s19 = smov %s3306_s5  ;;  %20 = sbr.rel (!%p18_p2) target bundleno = 9 (0x9), region = 100 }
 0x1a1   :  { %1924 = vsyncpa [#allocation4], 1 }
 0x1a2   :  { %1926 = vsyncpa [#allocation4 + $0x1], 1 }
 0x1a3   :  { %1927 = vsyncpa [#allocation7], 1 }
 0x1a4   :  { %1928 = vsyncpa [#allocation5], 1 }
 0x1a5   :  { %1930 = vsyncpa [#allocation5 + $0x1], 1 }

</bundles_post_ra>
